<compile_context>
chip_gen: v7x
topology: tpu7x:2x2x1
jax: 0.10.0
libtpu: 0.0.40
codegen_flags: <defaults>
</compile_context>

<pallas_src>
import jax
import jax.numpy as jnp
from jax.experimental import pallas as pl
from jax.experimental.pallas import tpu as pltpu

LANES = 128                        # vreg lane width / flat-layout minor dim
MAX_PAD = 4                        # largest conv half-width (kernel 9 -> pad 4)
NUM_TAPS = 2 * MAX_PAD + 1         # tap offsets -4 .. +4
# Output-channel structure fixed by the module:
#   ch0 = identity(x), ch1 = k1 conv, ch2-3 = k3, ch4-5 = k5, ch6-7 = k7, ch8-9 = k9
CHANNEL_KSIZE = (0, 1, 3, 3, 5, 5, 7, 7, 9, 9)   # 0 => identity passthrough
NUM_OUT_CH = len(CHANNEL_KSIZE)
NUM_GROUPS = 2                     # channel groups -> extra (parallel) grid axis
CPG = NUM_OUT_CH // NUM_GROUPS     # channels per group (5)
ROW_CHUNK = 8                      # flat rows per in-kernel chunk (1 vreg / window)


def _make_kernel(feat):
    """Builds the kernel for feature width `feat` (= F, the non-conv axis)."""
    groups = [tuple(range(g * CPG, (g + 1) * CPG)) for g in range(NUM_GROUPS)]

    def kernel(x_ref, w_ref, o_ref):
        # x_ref: (1, R, 128) VMEM   - one batch, (T, F) plane flattened to 128-lane rows
        # w_ref: (10, 9)     SMEM   - tap for offset d of channel c at w_ref[c, MAX_PAD+d]
        # o_ref: (1, CPG, R, 128)   - this grid step's channel group
        g = pl.program_id(1)
        R, L = x_ref.shape[1], x_ref.shape[2]
        lane = jax.lax.broadcasted_iota(jnp.int32, (1, L), 1)
        zrow = jnp.zeros((1, L), x_ref.dtype)

        def lane_shift(arr, amount):
            amount = amount % L
            return arr if amount == 0 else pltpu.roll(arr, shift=amount, axis=1)

        def compute_group(channels):
            max_p = max(CHANNEL_KSIZE[c] for c in channels) // 2

            # Hoist the scalar tap reads (SMEM) out of the row-chunk loop.
            taps = {}
            for c in channels:
                k = CHANNEL_KSIZE[c]
                if k == 0:
                    continue
                p = k // 2
                for d in range(-p, p + 1):
                    taps[(c, d)] = w_ref[c, MAX_PAD + d]

            # Lane-carry masks: True -> value comes from the same flat row.
            keep = {}
            for d in range(1, max_p + 1):
                keep[d] = lane < (L - d * feat)
                keep[-d] = lane >= (d * feat)

            for r0 in range(0, R, ROW_CHUNK):
                rows = min(ROW_CHUNK, R - r0)
                cur = x_ref[0, r0:r0 + rows, :]                               # (rows, L)
                nxt = x_ref[0, r0 + rows:r0 + rows + 1, :] if r0 + rows < R else zrow
                prv = x_ref[0, r0 - 1:r0, :] if r0 > 0 else zrow
                # Row r+1 / r-1 views; the zero rows supply the conv's zero padding.
                x_next = jnp.concatenate([cur[1:], nxt], axis=0) if rows > 1 else nxt
                x_prev = jnp.concatenate([prv, cur[:-1]], axis=0) if rows > 1 else prv

                # Shifted windows: shifted[d][r, l] == flat_x[r*L + l + d*feat] (0 outside).
                shifted = {0: cur}
                for d in range(1, max_p + 1):
                    s = d * feat
                    shifted[d] = jnp.where(keep[d],
                                           lane_shift(cur, L - s),
                                           lane_shift(x_next, L - s))
                    shifted[-d] = jnp.where(keep[-d],
                                            lane_shift(cur, s),
                                            lane_shift(x_prev, s))

                for lc, c in enumerate(channels):
                    k = CHANNEL_KSIZE[c]
                    if k == 0:                      # identity channel
                        out = cur
                    else:
                        p = k // 2
                        out = taps[(c, -p)] * shifted[-p]
                        for d in range(-p + 1, p + 1):
                            out = out + taps[(c, d)] * shifted[d]
                    o_ref[0, lc, r0:r0 + rows, :] = out.astype(o_ref.dtype)

        @pl.when(g == 0)
        def _():
            compute_group(groups[0])

        @pl.when(g == 1)
        def _():
            compute_group(groups[1])

    return kernel


def _pack_weights(conv_weights):
    """Pack the 5 Conv2d weights (shapes (c_out, 1, 1, k)) into a (10, 9) table.

    Row c, column MAX_PAD + d holds the tap applied to x[t + d] for output
    channel c (Conv2d is cross-correlation).  Row 0 is the identity channel."""
    table = jnp.zeros((NUM_OUT_CH, NUM_TAPS), jnp.float32)
    table = table.at[0, MAX_PAD].set(1.0)
    ch = 1
    for w in conv_weights:
        c_out, _, _, k = w.shape
        p = k // 2
        table = table.at[ch:ch + c_out, MAX_PAD - p:MAX_PAD - p + k].set(
            w.reshape(c_out, k).astype(jnp.float32))
        ch += c_out
    return table


def multi_scale_forward(x, conv_weights):
    """x: (B, T, F).  Returns (B, 10, T, F), matching Multi_scale.forward."""
    B, T, F = x.shape
    if (T * F) % LANES != 0:
        # TODO(synk): support T*F not a multiple of 128 by padding the flat layout.
        raise ValueError(f"T*F={T * F} must be a multiple of {LANES}")
    if MAX_PAD * F > LANES:
        # TODO(synk): support F > 32 (a tap shift would span more than one flat row).
        raise ValueError(f"F={F} too large for the single-row-carry layout")
    R = (T * F) // LANES

    w_table = _pack_weights(conv_weights)
    # Free, contiguous reshape: (B, T, F) -> (B, R, 128).
    x_flat = x.reshape(B, R, LANES)

    out = pl.pallas_call(
        _make_kernel(F),
        out_shape=jax.ShapeDtypeStruct((B, NUM_OUT_CH, R, LANES), x.dtype),
        grid=(B, NUM_GROUPS),
        in_specs=[
            pl.BlockSpec((1, R, LANES), lambda b, g: (b, 0, 0)),
            pl.BlockSpec(memory_space=pltpu.MemorySpace.SMEM),
        ],
        out_specs=pl.BlockSpec((1, CPG, R, LANES), lambda b, g: (b, g, 0, 0)),
        compiler_params=pltpu.CompilerParams(
            dimension_semantics=("parallel", "parallel")),
    )(x_flat, w_table)
    # Free, contiguous reshape back to the PyTorch output layout.
    return out.reshape(B, NUM_OUT_CH, T, F)


# --------------------- pure-JAX reference (for checking) ---------------------

def multi_scale_reference(x, conv_weights):
    B, T, F = x.shape
    outs = [x]                                     # identity channel
    for w in conv_weights:
        c_out, _, _, k = w.shape
        p = k // 2
        xp = jnp.pad(x, ((0, 0), (p, p), (0, 0)))
        for co in range(c_out):
            acc = jnp.zeros_like(x)
            for j in range(k):
                acc = acc + w[co, 0, 0, j] * xp[:, j:j + T, :]
            outs.append(acc)
    return jnp.stack(outs, axis=1)                 # (B, 10, T, F)


# ----------------------------------- main ------------------------------------

if __name__ == "__main__":
    key = jax.random.PRNGKey(0)
    k_x, k0, k1, k2, k3, k4 = jax.random.split(key, 6)

    B, T, F = 2, 128, 16            # small smoke-test shapes; real model uses T=512, F=16
    x = jax.random.normal(k_x, (B, T, F), jnp.float32)

    conv_weights = [
        jax.random.normal(k0, (1, 1, 1, 1), jnp.float32) * 0.1,
        jax.random.normal(k1, (2, 1, 1, 3), jnp.float32) * 0.1,
        jax.random.normal(k2, (2, 1, 1, 5), jnp.float32) * 0.1,
        jax.random.normal(k3, (2, 1, 1, 7), jnp.float32) * 0.1,
        jax.random.normal(k4, (2, 1, 1, 9), jnp.float32) * 0.1,
    ]

    fwd = jax.jit(multi_scale_forward)
    out = jax.block_until_ready(fwd(x, conv_weights))
    assert out.shape == (B, NUM_OUT_CH, T, F), out.shape

    ref = jax.block_until_ready(multi_scale_reference(x, conv_weights))
    assert jnp.allclose(out, ref, atol=1e-5, rtol=1e-5), float(
        jnp.max(jnp.abs(out - ref)))

    print("KERNEL_OK")
</pallas_src>

<mosaic_0001>
module attributes {stable_mosaic.version = 11 : i64} {
  func.func @kernel(%arg0: i32, %arg1: i32, %arg2: memref<1x16x128xf32, #tpu.memory_space<vmem>>, %arg3: memref<10x9xf32, #tpu.memory_space<smem>>, %arg4: memref<1x5x16x128xf32, #tpu.memory_space<vmem>>) attributes {dimension_semantics = [#tpu.dimension_semantics<parallel>, #tpu.dimension_semantics<parallel>], iteration_bounds = array<i64: 2, 2>, scalar_prefetch = 0 : i64, scratch_operands = 0 : i64, tpu.core_type = #tpu.core_type<tc>, window_params = [{transform_indices = @transform_0, window_bounds = array<i64: 1, 16, 128>}, {transform_indices = @transform_1, window_bounds = array<i64: 10, 9>}, {transform_indices = @transform_2, window_bounds = array<i64: 1, 5, 16, 128>}]} {
    %0 = tpu.iota {dimensions = array<i32: 1>} : vector<1x128xi32>
    %cst = arith.constant 0.000000e+00 : f32
    %1 = vector.broadcast %cst : f32 to vector<1x128xf32>
    %c0_i32 = arith.constant 0 : i32
    %2 = arith.cmpi eq, %arg1, %c0_i32 : i32
    %3 = arith.extui %2 : i1 to i32
    %c0_i32_0 = arith.constant 0 : i32
    %4 = arith.cmpi ne, %3, %c0_i32_0 : i32
    scf.if %4 {
      %c1 = arith.constant 1 : index
      %c4 = arith.constant 4 : index
      %8 = memref.load %arg3[%c1, %c4] : memref<10x9xf32, #tpu.memory_space<smem>>
      %c2 = arith.constant 2 : index
      %c3 = arith.constant 3 : index
      %9 = memref.load %arg3[%c2, %c3] : memref<10x9xf32, #tpu.memory_space<smem>>
      %c2_2 = arith.constant 2 : index
      %c4_3 = arith.constant 4 : index
      %10 = memref.load %arg3[%c2_2, %c4_3] : memref<10x9xf32, #tpu.memory_space<smem>>
      %c2_4 = arith.constant 2 : index
      %c5 = arith.constant 5 : index
      %11 = memref.load %arg3[%c2_4, %c5] : memref<10x9xf32, #tpu.memory_space<smem>>
      %c3_5 = arith.constant 3 : index
      %c3_6 = arith.constant 3 : index
      %12 = memref.load %arg3[%c3_5, %c3_6] : memref<10x9xf32, #tpu.memory_space<smem>>
      %c3_7 = arith.constant 3 : index
      %c4_8 = arith.constant 4 : index
      %13 = memref.load %arg3[%c3_7, %c4_8] : memref<10x9xf32, #tpu.memory_space<smem>>
      %c3_9 = arith.constant 3 : index
      %c5_10 = arith.constant 5 : index
      %14 = memref.load %arg3[%c3_9, %c5_10] : memref<10x9xf32, #tpu.memory_space<smem>>
      %c4_11 = arith.constant 4 : index
      %c2_12 = arith.constant 2 : index
      %15 = memref.load %arg3[%c4_11, %c2_12] : memref<10x9xf32, #tpu.memory_space<smem>>
      %c4_13 = arith.constant 4 : index
      %c3_14 = arith.constant 3 : index
      %16 = memref.load %arg3[%c4_13, %c3_14] : memref<10x9xf32, #tpu.memory_space<smem>>
      %c4_15 = arith.constant 4 : index
      %c4_16 = arith.constant 4 : index
      %17 = memref.load %arg3[%c4_15, %c4_16] : memref<10x9xf32, #tpu.memory_space<smem>>
      %c4_17 = arith.constant 4 : index
      %c5_18 = arith.constant 5 : index
      %18 = memref.load %arg3[%c4_17, %c5_18] : memref<10x9xf32, #tpu.memory_space<smem>>
      %c4_19 = arith.constant 4 : index
      %c6 = arith.constant 6 : index
      %19 = memref.load %arg3[%c4_19, %c6] : memref<10x9xf32, #tpu.memory_space<smem>>
      %c112_i32 = arith.constant 112 : i32
      %20 = vector.broadcast %c112_i32 : i32 to vector<1x128xi32>
      %21 = arith.cmpi slt, %0, %20 : vector<1x128xi32>
      %c16_i32 = arith.constant 16 : i32
      %22 = vector.broadcast %c16_i32 : i32 to vector<1x128xi32>
      %23 = arith.cmpi sge, %0, %22 : vector<1x128xi32>
      %c96_i32 = arith.constant 96 : i32
      %24 = vector.broadcast %c96_i32 : i32 to vector<1x128xi32>
      %25 = arith.cmpi slt, %0, %24 : vector<1x128xi32>
      %c32_i32 = arith.constant 32 : i32
      %26 = vector.broadcast %c32_i32 : i32 to vector<1x128xi32>
      %27 = arith.cmpi sge, %0, %26 : vector<1x128xi32>
      %c0 = arith.constant 0 : index
      %c0_20 = arith.constant 0 : index
      %c0_21 = arith.constant 0 : index
      %28 = vector.load %arg2[%c0, %c0_20, %c0_21] : memref<1x16x128xf32, #tpu.memory_space<vmem>>, vector<1x8x128xf32>
      %29 = vector.shape_cast %28 : vector<1x8x128xf32> to vector<8x128xf32>
      %c0_22 = arith.constant 0 : index
      %c8 = arith.constant 8 : index
      %c0_23 = arith.constant 0 : index
      %30 = vector.load %arg2[%c0_22, %c8, %c0_23] : memref<1x16x128xf32, #tpu.memory_space<vmem>>, vector<1x1x128xf32>
      %31 = vector.shape_cast %30 : vector<1x1x128xf32> to vector<1x128xf32>
      %32 = vector.extract_strided_slice %29 {offsets = [1, 0], sizes = [7, 128], strides = [1, 1]} : vector<8x128xf32> to vector<7x128xf32>
      %33 = tpu.concatenate %32, %31 in 0 : vector<7x128xf32>, vector<1x128xf32> -> vector<8x128xf32>
      %34 = vector.extract_strided_slice %29 {offsets = [0, 0], sizes = [7, 128], strides = [1, 1]} : vector<8x128xf32> to vector<7x128xf32>
      %35 = tpu.concatenate %1, %34 in 0 : vector<1x128xf32>, vector<7x128xf32> -> vector<8x128xf32>
      %c112_i32_24 = arith.constant 112 : i32
      %36 = tpu.dynamic_rotate %29 by %c112_i32_24 dim 1 : vector<8x128xf32>, i32 -> vector<8x128xf32>
      %c112_i32_25 = arith.constant 112 : i32
      %37 = tpu.dynamic_rotate %33 by %c112_i32_25 dim 1 : vector<8x128xf32>, i32 -> vector<8x128xf32>
      %38 = vector.shape_cast %21 : vector<1x128xi1> to vector<1x128xi1>
      %39 = vector.broadcast %38 : vector<1x128xi1> to vector<8x128xi1>
      %40 = arith.select %39, %36, %37 : vector<8x128xi1>, vector<8x128xf32>
      %c16_i32_26 = arith.constant 16 : i32
      %41 = tpu.dynamic_rotate %29 by %c16_i32_26 dim 1 : vector<8x128xf32>, i32 -> vector<8x128xf32>
      %c16_i32_27 = arith.constant 16 : i32
      %42 = tpu.dynamic_rotate %35 by %c16_i32_27 dim 1 : vector<8x128xf32>, i32 -> vector<8x128xf32>
      %43 = vector.shape_cast %23 : vector<1x128xi1> to vector<1x128xi1>
      %44 = vector.broadcast %43 : vector<1x128xi1> to vector<8x128xi1>
      %45 = arith.select %44, %41, %42 : vector<8x128xi1>, vector<8x128xf32>
      %c96_i32_28 = arith.constant 96 : i32
      %46 = tpu.dynamic_rotate %29 by %c96_i32_28 dim 1 : vector<8x128xf32>, i32 -> vector<8x128xf32>
      %c96_i32_29 = arith.constant 96 : i32
      %47 = tpu.dynamic_rotate %33 by %c96_i32_29 dim 1 : vector<8x128xf32>, i32 -> vector<8x128xf32>
      %48 = vector.shape_cast %25 : vector<1x128xi1> to vector<1x128xi1>
      %49 = vector.broadcast %48 : vector<1x128xi1> to vector<8x128xi1>
      %50 = arith.select %49, %46, %47 : vector<8x128xi1>, vector<8x128xf32>
      %c32_i32_30 = arith.constant 32 : i32
      %51 = tpu.dynamic_rotate %29 by %c32_i32_30 dim 1 : vector<8x128xf32>, i32 -> vector<8x128xf32>
      %c32_i32_31 = arith.constant 32 : i32
      %52 = tpu.dynamic_rotate %35 by %c32_i32_31 dim 1 : vector<8x128xf32>, i32 -> vector<8x128xf32>
      %53 = vector.shape_cast %27 : vector<1x128xi1> to vector<1x128xi1>
      %54 = vector.broadcast %53 : vector<1x128xi1> to vector<8x128xi1>
      %55 = arith.select %54, %51, %52 : vector<8x128xi1>, vector<8x128xf32>
      %c0_32 = arith.constant 0 : index
      %c0_33 = arith.constant 0 : index
      %c0_34 = arith.constant 0 : index
      %c0_35 = arith.constant 0 : index
      %56 = vector.load %arg4[%c0_32, %c0_33, %c0_34, %c0_35] : memref<1x5x16x128xf32, #tpu.memory_space<vmem>>, vector<1x1x8x128xf32>
      %57 = vector.shape_cast %56 : vector<1x1x8x128xf32> to vector<8x128xf32>
      %58 = vector.shape_cast %29 : vector<8x128xf32> to vector<1x1x8x128xf32>
      tpu.vector_store %arg4[%c0_32, %c0_33, %c0_34, %c0_35], %58 {strides = array<i32>} : memref<1x5x16x128xf32, #tpu.memory_space<vmem>>, vector<1x1x8x128xf32>,
      %59 = vector.broadcast %8 : f32 to vector<8x128xf32>
      %60 = arith.mulf %59, %29 : vector<8x128xf32>
      %c0_36 = arith.constant 0 : index
      %c1_37 = arith.constant 1 : index
      %c0_38 = arith.constant 0 : index
      %c0_39 = arith.constant 0 : index
      %61 = vector.load %arg4[%c0_36, %c1_37, %c0_38, %c0_39] : memref<1x5x16x128xf32, #tpu.memory_space<vmem>>, vector<1x1x8x128xf32>
      %62 = vector.shape_cast %61 : vector<1x1x8x128xf32> to vector<8x128xf32>
      %63 = vector.shape_cast %60 : vector<8x128xf32> to vector<1x1x8x128xf32>
      tpu.vector_store %arg4[%c0_36, %c1_37, %c0_38, %c0_39], %63 {strides = array<i32>} : memref<1x5x16x128xf32, #tpu.memory_space<vmem>>, vector<1x1x8x128xf32>,
      %64 = vector.broadcast %9 : f32 to vector<8x128xf32>
      %65 = arith.mulf %64, %45 : vector<8x128xf32>
      %66 = vector.broadcast %10 : f32 to vector<8x128xf32>
      %67 = arith.mulf %66, %29 : vector<8x128xf32>
      %68 = arith.addf %65, %67 : vector<8x128xf32>
      %69 = vector.broadcast %11 : f32 to vector<8x128xf32>
      %70 = arith.mulf %69, %40 : vector<8x128xf32>
      %71 = arith.addf %68, %70 : vector<8x128xf32>
      %c0_40 = arith.constant 0 : index
      %c2_41 = arith.constant 2 : index
      %c0_42 = arith.constant 0 : index
      %c0_43 = arith.constant 0 : index
      %72 = vector.load %arg4[%c0_40, %c2_41, %c0_42, %c0_43] : memref<1x5x16x128xf32, #tpu.memory_space<vmem>>, vector<1x1x8x128xf32>
      %73 = vector.shape_cast %72 : vector<1x1x8x128xf32> to vector<8x128xf32>
      %74 = vector.shape_cast %71 : vector<8x128xf32> to vector<1x1x8x128xf32>
      tpu.vector_store %arg4[%c0_40, %c2_41, %c0_42, %c0_43], %74 {strides = array<i32>} : memref<1x5x16x128xf32, #tpu.memory_space<vmem>>, vector<1x1x8x128xf32>,
      %75 = vector.broadcast %12 : f32 to vector<8x128xf32>
      %76 = arith.mulf %75, %45 : vector<8x128xf32>
      %77 = vector.broadcast %13 : f32 to vector<8x128xf32>
      %78 = arith.mulf %77, %29 : vector<8x128xf32>
      %79 = arith.addf %76, %78 : vector<8x128xf32>
      %80 = vector.broadcast %14 : f32 to vector<8x128xf32>
      %81 = arith.mulf %80, %40 : vector<8x128xf32>
      %82 = arith.addf %79, %81 : vector<8x128xf32>
      %c0_44 = arith.constant 0 : index
      %c3_45 = arith.constant 3 : index
      %c0_46 = arith.constant 0 : index
      %c0_47 = arith.constant 0 : index
      %83 = vector.load %arg4[%c0_44, %c3_45, %c0_46, %c0_47] : memref<1x5x16x128xf32, #tpu.memory_space<vmem>>, vector<1x1x8x128xf32>
      %84 = vector.shape_cast %83 : vector<1x1x8x128xf32> to vector<8x128xf32>
      %85 = vector.shape_cast %82 : vector<8x128xf32> to vector<1x1x8x128xf32>
      tpu.vector_store %arg4[%c0_44, %c3_45, %c0_46, %c0_47], %85 {strides = array<i32>} : memref<1x5x16x128xf32, #tpu.memory_space<vmem>>, vector<1x1x8x128xf32>,
      %86 = vector.broadcast %15 : f32 to vector<8x128xf32>
      %87 = arith.mulf %86, %55 : vector<8x128xf32>
      %88 = vector.broadcast %16 : f32 to vector<8x128xf32>
      %89 = arith.mulf %88, %45 : vector<8x128xf32>
      %90 = arith.addf %87, %89 : vector<8x128xf32>
      %91 = vector.broadcast %17 : f32 to vector<8x128xf32>
      %92 = arith.mulf %91, %29 : vector<8x128xf32>
      %93 = arith.addf %90, %92 : vector<8x128xf32>
      %94 = vector.broadcast %18 : f32 to vector<8x128xf32>
      %95 = arith.mulf %94, %40 : vector<8x128xf32>
      %96 = arith.addf %93, %95 : vector<8x128xf32>
      %97 = vector.broadcast %19 : f32 to vector<8x128xf32>
      %98 = arith.mulf %97, %50 : vector<8x128xf32>
      %99 = arith.addf %96, %98 : vector<8x128xf32>
      %c0_48 = arith.constant 0 : index
      %c4_49 = arith.constant 4 : index
      %c0_50 = arith.constant 0 : index
      %c0_51 = arith.constant 0 : index
      %100 = vector.load %arg4[%c0_48, %c4_49, %c0_50, %c0_51] : memref<1x5x16x128xf32, #tpu.memory_space<vmem>>, vector<1x1x8x128xf32>
      %101 = vector.shape_cast %100 : vector<1x1x8x128xf32> to vector<8x128xf32>
      %102 = vector.shape_cast %99 : vector<8x128xf32> to vector<1x1x8x128xf32>
      tpu.vector_store %arg4[%c0_48, %c4_49, %c0_50, %c0_51], %102 {strides = array<i32>} : memref<1x5x16x128xf32, #tpu.memory_space<vmem>>, vector<1x1x8x128xf32>,
      %c0_52 = arith.constant 0 : index
      %c8_53 = arith.constant 8 : index
      %c0_54 = arith.constant 0 : index
      %103 = vector.load %arg2[%c0_52, %c8_53, %c0_54] : memref<1x16x128xf32, #tpu.memory_space<vmem>>, vector<1x8x128xf32>
      %104 = vector.shape_cast %103 : vector<1x8x128xf32> to vector<8x128xf32>
      %c0_55 = arith.constant 0 : index
      %c7 = arith.constant 7 : index
      %c0_56 = arith.constant 0 : index
      %105 = vector.load %arg2[%c0_55, %c7, %c0_56] : memref<1x16x128xf32, #tpu.memory_space<vmem>>, vector<1x1x128xf32>
      %106 = vector.shape_cast %105 : vector<1x1x128xf32> to vector<1x128xf32>
      %107 = vector.extract_strided_slice %104 {offsets = [1, 0], sizes = [7, 128], strides = [1, 1]} : vector<8x128xf32> to vector<7x128xf32>
      %108 = tpu.concatenate %107, %1 in 0 : vector<7x128xf32>, vector<1x128xf32> -> vector<8x128xf32>
      %109 = vector.extract_strided_slice %104 {offsets = [0, 0], sizes = [7, 128], strides = [1, 1]} : vector<8x128xf32> to vector<7x128xf32>
      %110 = tpu.concatenate %106, %109 in 0 : vector<1x128xf32>, vector<7x128xf32> -> vector<8x128xf32>
      %c112_i32_57 = arith.constant 112 : i32
      %111 = tpu.dynamic_rotate %104 by %c112_i32_57 dim 1 : vector<8x128xf32>, i32 -> vector<8x128xf32>
      %c112_i32_58 = arith.constant 112 : i32
      %112 = tpu.dynamic_rotate %108 by %c112_i32_58 dim 1 : vector<8x128xf32>, i32 -> vector<8x128xf32>
      %113 = vector.shape_cast %21 : vector<1x128xi1> to vector<1x128xi1>
      %114 = vector.broadcast %113 : vector<1x128xi1> to vector<8x128xi1>
      %115 = arith.select %114, %111, %112 : vector<8x128xi1>, vector<8x128xf32>
      %c16_i32_59 = arith.constant 16 : i32
      %116 = tpu.dynamic_rotate %104 by %c16_i32_59 dim 1 : vector<8x128xf32>, i32 -> vector<8x128xf32>
      %c16_i32_60 = arith.constant 16 : i32
      %117 = tpu.dynamic_rotate %110 by %c16_i32_60 dim 1 : vector<8x128xf32>, i32 -> vector<8x128xf32>
      %118 = vector.shape_cast %23 : vector<1x128xi1> to vector<1x128xi1>
      %119 = vector.broadcast %118 : vector<1x128xi1> to vector<8x128xi1>
      %120 = arith.select %119, %116, %117 : vector<8x128xi1>, vector<8x128xf32>
      %c96_i32_61 = arith.constant 96 : i32
      %121 = tpu.dynamic_rotate %104 by %c96_i32_61 dim 1 : vector<8x128xf32>, i32 -> vector<8x128xf32>
      %c96_i32_62 = arith.constant 96 : i32
      %122 = tpu.dynamic_rotate %108 by %c96_i32_62 dim 1 : vector<8x128xf32>, i32 -> vector<8x128xf32>
      %123 = vector.shape_cast %25 : vector<1x128xi1> to vector<1x128xi1>
      %124 = vector.broadcast %123 : vector<1x128xi1> to vector<8x128xi1>
      %125 = arith.select %124, %121, %122 : vector<8x128xi1>, vector<8x128xf32>
      %c32_i32_63 = arith.constant 32 : i32
      %126 = tpu.dynamic_rotate %104 by %c32_i32_63 dim 1 : vector<8x128xf32>, i32 -> vector<8x128xf32>
      %c32_i32_64 = arith.constant 32 : i32
      %127 = tpu.dynamic_rotate %110 by %c32_i32_64 dim 1 : vector<8x128xf32>, i32 -> vector<8x128xf32>
      %128 = vector.shape_cast %27 : vector<1x128xi1> to vector<1x128xi1>
      %129 = vector.broadcast %128 : vector<1x128xi1> to vector<8x128xi1>
      %130 = arith.select %129, %126, %127 : vector<8x128xi1>, vector<8x128xf32>
      %c0_65 = arith.constant 0 : index
      %c0_66 = arith.constant 0 : index
      %c8_67 = arith.constant 8 : index
      %c0_68 = arith.constant 0 : index
      %131 = vector.load %arg4[%c0_65, %c0_66, %c8_67, %c0_68] : memref<1x5x16x128xf32, #tpu.memory_space<vmem>>, vector<1x1x8x128xf32>
      %132 = vector.shape_cast %131 : vector<1x1x8x128xf32> to vector<8x128xf32>
      %133 = vector.shape_cast %104 : vector<8x128xf32> to vector<1x1x8x128xf32>
      tpu.vector_store %arg4[%c0_65, %c0_66, %c8_67, %c0_68], %133 {strides = array<i32>} : memref<1x5x16x128xf32, #tpu.memory_space<vmem>>, vector<1x1x8x128xf32>,
      %134 = vector.broadcast %8 : f32 to vector<8x128xf32>
      %135 = arith.mulf %134, %104 : vector<8x128xf32>
      %c0_69 = arith.constant 0 : index
      %c1_70 = arith.constant 1 : index
      %c8_71 = arith.constant 8 : index
      %c0_72 = arith.constant 0 : index
      %136 = vector.load %arg4[%c0_69, %c1_70, %c8_71, %c0_72] : memref<1x5x16x128xf32, #tpu.memory_space<vmem>>, vector<1x1x8x128xf32>
      %137 = vector.shape_cast %136 : vector<1x1x8x128xf32> to vector<8x128xf32>
      %138 = vector.shape_cast %135 : vector<8x128xf32> to vector<1x1x8x128xf32>
      tpu.vector_store %arg4[%c0_69, %c1_70, %c8_71, %c0_72], %138 {strides = array<i32>} : memref<1x5x16x128xf32, #tpu.memory_space<vmem>>, vector<1x1x8x128xf32>,
      %139 = vector.broadcast %9 : f32 to vector<8x128xf32>
      %140 = arith.mulf %139, %120 : vector<8x128xf32>
      %141 = vector.broadcast %10 : f32 to vector<8x128xf32>
      %142 = arith.mulf %141, %104 : vector<8x128xf32>
      %143 = arith.addf %140, %142 : vector<8x128xf32>
      %144 = vector.broadcast %11 : f32 to vector<8x128xf32>
      %145 = arith.mulf %144, %115 : vector<8x128xf32>
      %146 = arith.addf %143, %145 : vector<8x128xf32>
      %c0_73 = arith.constant 0 : index
      %c2_74 = arith.constant 2 : index
      %c8_75 = arith.constant 8 : index
      %c0_76 = arith.constant 0 : index
      %147 = vector.load %arg4[%c0_73, %c2_74, %c8_75, %c0_76] : memref<1x5x16x128xf32, #tpu.memory_space<vmem>>, vector<1x1x8x128xf32>
      %148 = vector.shape_cast %147 : vector<1x1x8x128xf32> to vector<8x128xf32>
      %149 = vector.shape_cast %146 : vector<8x128xf32> to vector<1x1x8x128xf32>
      tpu.vector_store %arg4[%c0_73, %c2_74, %c8_75, %c0_76], %149 {strides = array<i32>} : memref<1x5x16x128xf32, #tpu.memory_space<vmem>>, vector<1x1x8x128xf32>,
      %150 = vector.broadcast %12 : f32 to vector<8x128xf32>
      %151 = arith.mulf %150, %120 : vector<8x128xf32>
      %152 = vector.broadcast %13 : f32 to vector<8x128xf32>
      %153 = arith.mulf %152, %104 : vector<8x128xf32>
      %154 = arith.addf %151, %153 : vector<8x128xf32>
      %155 = vector.broadcast %14 : f32 to vector<8x128xf32>
      %156 = arith.mulf %155, %115 : vector<8x128xf32>
      %157 = arith.addf %154, %156 : vector<8x128xf32>
      %c0_77 = arith.constant 0 : index
      %c3_78 = arith.constant 3 : index
      %c8_79 = arith.constant 8 : index
      %c0_80 = arith.constant 0 : index
      %158 = vector.load %arg4[%c0_77, %c3_78, %c8_79, %c0_80] : memref<1x5x16x128xf32, #tpu.memory_space<vmem>>, vector<1x1x8x128xf32>
      %159 = vector.shape_cast %158 : vector<1x1x8x128xf32> to vector<8x128xf32>
      %160 = vector.shape_cast %157 : vector<8x128xf32> to vector<1x1x8x128xf32>
      tpu.vector_store %arg4[%c0_77, %c3_78, %c8_79, %c0_80], %160 {strides = array<i32>} : memref<1x5x16x128xf32, #tpu.memory_space<vmem>>, vector<1x1x8x128xf32>,
      %161 = vector.broadcast %15 : f32 to vector<8x128xf32>
      %162 = arith.mulf %161, %130 : vector<8x128xf32>
      %163 = vector.broadcast %16 : f32 to vector<8x128xf32>
      %164 = arith.mulf %163, %120 : vector<8x128xf32>
      %165 = arith.addf %162, %164 : vector<8x128xf32>
      %166 = vector.broadcast %17 : f32 to vector<8x128xf32>
      %167 = arith.mulf %166, %104 : vector<8x128xf32>
      %168 = arith.addf %165, %167 : vector<8x128xf32>
      %169 = vector.broadcast %18 : f32 to vector<8x128xf32>
      %170 = arith.mulf %169, %115 : vector<8x128xf32>
      %171 = arith.addf %168, %170 : vector<8x128xf32>
      %172 = vector.broadcast %19 : f32 to vector<8x128xf32>
      %173 = arith.mulf %172, %125 : vector<8x128xf32>
      %174 = arith.addf %171, %173 : vector<8x128xf32>
      %c0_81 = arith.constant 0 : index
      %c4_82 = arith.constant 4 : index
      %c8_83 = arith.constant 8 : index
      %c0_84 = arith.constant 0 : index
      %175 = vector.load %arg4[%c0_81, %c4_82, %c8_83, %c0_84] : memref<1x5x16x128xf32, #tpu.memory_space<vmem>>, vector<1x1x8x128xf32>
      %176 = vector.shape_cast %175 : vector<1x1x8x128xf32> to vector<8x128xf32>
      %177 = vector.shape_cast %174 : vector<8x128xf32> to vector<1x1x8x128xf32>
      tpu.vector_store %arg4[%c0_81, %c4_82, %c8_83, %c0_84], %177 {strides = array<i32>} : memref<1x5x16x128xf32, #tpu.memory_space<vmem>>, vector<1x1x8x128xf32>,
    } else {
    }
    %c1_i32 = arith.constant 1 : i32
    %5 = arith.cmpi eq, %arg1, %c1_i32 : i32
    %6 = arith.extui %5 : i1 to i32
    %c0_i32_1 = arith.constant 0 : i32
    %7 = arith.cmpi ne, %6, %c0_i32_1 : i32
    scf.if %7 {
      %c5 = arith.constant 5 : index
      %c2 = arith.constant 2 : index
      %8 = memref.load %arg3[%c5, %c2] : memref<10x9xf32, #tpu.memory_space<smem>>
      %c5_2 = arith.constant 5 : index
      %c3 = arith.constant 3 : index
      %9 = memref.load %arg3[%c5_2, %c3] : memref<10x9xf32, #tpu.memory_space<smem>>
      %c5_3 = arith.constant 5 : index
      %c4 = arith.constant 4 : index
      %10 = memref.load %arg3[%c5_3, %c4] : memref<10x9xf32, #tpu.memory_space<smem>>
      %c5_4 = arith.constant 5 : index
      %c5_5 = arith.constant 5 : index
      %11 = memref.load %arg3[%c5_4, %c5_5] : memref<10x9xf32, #tpu.memory_space<smem>>
      %c5_6 = arith.constant 5 : index
      %c6 = arith.constant 6 : index
      %12 = memref.load %arg3[%c5_6, %c6] : memref<10x9xf32, #tpu.memory_space<smem>>
      %c6_7 = arith.constant 6 : index
      %c1 = arith.constant 1 : index
      %13 = memref.load %arg3[%c6_7, %c1] : memref<10x9xf32, #tpu.memory_space<smem>>
      %c6_8 = arith.constant 6 : index
      %c2_9 = arith.constant 2 : index
      %14 = memref.load %arg3[%c6_8, %c2_9] : memref<10x9xf32, #tpu.memory_space<smem>>
      %c6_10 = arith.constant 6 : index
      %c3_11 = arith.constant 3 : index
      %15 = memref.load %arg3[%c6_10, %c3_11] : memref<10x9xf32, #tpu.memory_space<smem>>
      %c6_12 = arith.constant 6 : index
      %c4_13 = arith.constant 4 : index
      %16 = memref.load %arg3[%c6_12, %c4_13] : memref<10x9xf32, #tpu.memory_space<smem>>
      %c6_14 = arith.constant 6 : index
      %c5_15 = arith.constant 5 : index
      %17 = memref.load %arg3[%c6_14, %c5_15] : memref<10x9xf32, #tpu.memory_space<smem>>
      %c6_16 = arith.constant 6 : index
      %c6_17 = arith.constant 6 : index
      %18 = memref.load %arg3[%c6_16, %c6_17] : memref<10x9xf32, #tpu.memory_space<smem>>
      %c6_18 = arith.constant 6 : index
      %c7 = arith.constant 7 : index
      %19 = memref.load %arg3[%c6_18, %c7] : memref<10x9xf32, #tpu.memory_space<smem>>
      %c7_19 = arith.constant 7 : index
      %c1_20 = arith.constant 1 : index
      %20 = memref.load %arg3[%c7_19, %c1_20] : memref<10x9xf32, #tpu.memory_space<smem>>
      %c7_21 = arith.constant 7 : index
      %c2_22 = arith.constant 2 : index
      %21 = memref.load %arg3[%c7_21, %c2_22] : memref<10x9xf32, #tpu.memory_space<smem>>
      %c7_23 = arith.constant 7 : index
      %c3_24 = arith.constant 3 : index
      %22 = memref.load %arg3[%c7_23, %c3_24] : memref<10x9xf32, #tpu.memory_space<smem>>
      %c7_25 = arith.constant 7 : index
      %c4_26 = arith.constant 4 : index
      %23 = memref.load %arg3[%c7_25, %c4_26] : memref<10x9xf32, #tpu.memory_space<smem>>
      %c7_27 = arith.constant 7 : index
      %c5_28 = arith.constant 5 : index
      %24 = memref.load %arg3[%c7_27, %c5_28] : memref<10x9xf32, #tpu.memory_space<smem>>
      %c7_29 = arith.constant 7 : index
      %c6_30 = arith.constant 6 : index
      %25 = memref.load %arg3[%c7_29, %c6_30] : memref<10x9xf32, #tpu.memory_space<smem>>
      %c7_31 = arith.constant 7 : index
      %c7_32 = arith.constant 7 : index
      %26 = memref.load %arg3[%c7_31, %c7_32] : memref<10x9xf32, #tpu.memory_space<smem>>
      %c8 = arith.constant 8 : index
      %c0 = arith.constant 0 : index
      %27 = memref.load %arg3[%c8, %c0] : memref<10x9xf32, #tpu.memory_space<smem>>
      %c8_33 = arith.constant 8 : index
      %c1_34 = arith.constant 1 : index
      %28 = memref.load %arg3[%c8_33, %c1_34] : memref<10x9xf32, #tpu.memory_space<smem>>
      %c8_35 = arith.constant 8 : index
      %c2_36 = arith.constant 2 : index
      %29 = memref.load %arg3[%c8_35, %c2_36] : memref<10x9xf32, #tpu.memory_space<smem>>
      %c8_37 = arith.constant 8 : index
      %c3_38 = arith.constant 3 : index
      %30 = memref.load %arg3[%c8_37, %c3_38] : memref<10x9xf32, #tpu.memory_space<smem>>
      %c8_39 = arith.constant 8 : index
      %c4_40 = arith.constant 4 : index
      %31 = memref.load %arg3[%c8_39, %c4_40] : memref<10x9xf32, #tpu.memory_space<smem>>
      %c8_41 = arith.constant 8 : index
      %c5_42 = arith.constant 5 : index
      %32 = memref.load %arg3[%c8_41, %c5_42] : memref<10x9xf32, #tpu.memory_space<smem>>
      %c8_43 = arith.constant 8 : index
      %c6_44 = arith.constant 6 : index
      %33 = memref.load %arg3[%c8_43, %c6_44] : memref<10x9xf32, #tpu.memory_space<smem>>
      %c8_45 = arith.constant 8 : index
      %c7_46 = arith.constant 7 : index
      %34 = memref.load %arg3[%c8_45, %c7_46] : memref<10x9xf32, #tpu.memory_space<smem>>
      %c8_47 = arith.constant 8 : index
      %c8_48 = arith.constant 8 : index
      %35 = memref.load %arg3[%c8_47, %c8_48] : memref<10x9xf32, #tpu.memory_space<smem>>
      %c9 = arith.constant 9 : index
      %c0_49 = arith.constant 0 : index
      %36 = memref.load %arg3[%c9, %c0_49] : memref<10x9xf32, #tpu.memory_space<smem>>
      %c9_50 = arith.constant 9 : index
      %c1_51 = arith.constant 1 : index
      %37 = memref.load %arg3[%c9_50, %c1_51] : memref<10x9xf32, #tpu.memory_space<smem>>
      %c9_52 = arith.constant 9 : index
      %c2_53 = arith.constant 2 : index
      %38 = memref.load %arg3[%c9_52, %c2_53] : memref<10x9xf32, #tpu.memory_space<smem>>
      %c9_54 = arith.constant 9 : index
      %c3_55 = arith.constant 3 : index
      %39 = memref.load %arg3[%c9_54, %c3_55] : memref<10x9xf32, #tpu.memory_space<smem>>
      %c9_56 = arith.constant 9 : index
      %c4_57 = arith.constant 4 : index
      %40 = memref.load %arg3[%c9_56, %c4_57] : memref<10x9xf32, #tpu.memory_space<smem>>
      %c9_58 = arith.constant 9 : index
      %c5_59 = arith.constant 5 : index
      %41 = memref.load %arg3[%c9_58, %c5_59] : memref<10x9xf32, #tpu.memory_space<smem>>
      %c9_60 = arith.constant 9 : index
      %c6_61 = arith.constant 6 : index
      %42 = memref.load %arg3[%c9_60, %c6_61] : memref<10x9xf32, #tpu.memory_space<smem>>
      %c9_62 = arith.constant 9 : index
      %c7_63 = arith.constant 7 : index
      %43 = memref.load %arg3[%c9_62, %c7_63] : memref<10x9xf32, #tpu.memory_space<smem>>
      %c9_64 = arith.constant 9 : index
      %c8_65 = arith.constant 8 : index
      %44 = memref.load %arg3[%c9_64, %c8_65] : memref<10x9xf32, #tpu.memory_space<smem>>
      %c112_i32 = arith.constant 112 : i32
      %45 = vector.broadcast %c112_i32 : i32 to vector<1x128xi32>
      %46 = arith.cmpi slt, %0, %45 : vector<1x128xi32>
      %c16_i32 = arith.constant 16 : i32
      %47 = vector.broadcast %c16_i32 : i32 to vector<1x128xi32>
      %48 = arith.cmpi sge, %0, %47 : vector<1x128xi32>
      %c96_i32 = arith.constant 96 : i32
      %49 = vector.broadcast %c96_i32 : i32 to vector<1x128xi32>
      %50 = arith.cmpi slt, %0, %49 : vector<1x128xi32>
      %c32_i32 = arith.constant 32 : i32
      %51 = vector.broadcast %c32_i32 : i32 to vector<1x128xi32>
      %52 = arith.cmpi sge, %0, %51 : vector<1x128xi32>
      %c80_i32 = arith.constant 80 : i32
      %53 = vector.broadcast %c80_i32 : i32 to vector<1x128xi32>
      %54 = arith.cmpi slt, %0, %53 : vector<1x128xi32>
      %c48_i32 = arith.constant 48 : i32
      %55 = vector.broadcast %c48_i32 : i32 to vector<1x128xi32>
      %56 = arith.cmpi sge, %0, %55 : vector<1x128xi32>
      %c64_i32 = arith.constant 64 : i32
      %57 = vector.broadcast %c64_i32 : i32 to vector<1x128xi32>
      %58 = arith.cmpi slt, %0, %57 : vector<1x128xi32>
      %c64_i32_66 = arith.constant 64 : i32
      %59 = vector.broadcast %c64_i32_66 : i32 to vector<1x128xi32>
      %60 = arith.cmpi sge, %0, %59 : vector<1x128xi32>
      %c0_67 = arith.constant 0 : index
      %c0_68 = arith.constant 0 : index
      %c0_69 = arith.constant 0 : index
      %61 = vector.load %arg2[%c0_67, %c0_68, %c0_69] : memref<1x16x128xf32, #tpu.memory_space<vmem>>, vector<1x8x128xf32>
      %62 = vector.shape_cast %61 : vector<1x8x128xf32> to vector<8x128xf32>
      %c0_70 = arith.constant 0 : index
      %c8_71 = arith.constant 8 : index
      %c0_72 = arith.constant 0 : index
      %63 = vector.load %arg2[%c0_70, %c8_71, %c0_72] : memref<1x16x128xf32, #tpu.memory_space<vmem>>, vector<1x1x128xf32>
      %64 = vector.shape_cast %63 : vector<1x1x128xf32> to vector<1x128xf32>
      %65 = vector.extract_strided_slice %62 {offsets = [1, 0], sizes = [7, 128], strides = [1, 1]} : vector<8x128xf32> to vector<7x128xf32>
      %66 = tpu.concatenate %65, %64 in 0 : vector<7x128xf32>, vector<1x128xf32> -> vector<8x128xf32>
      %67 = vector.extract_strided_slice %62 {offsets = [0, 0], sizes = [7, 128], strides = [1, 1]} : vector<8x128xf32> to vector<7x128xf32>
      %68 = tpu.concatenate %1, %67 in 0 : vector<1x128xf32>, vector<7x128xf32> -> vector<8x128xf32>
      %c112_i32_73 = arith.constant 112 : i32
      %69 = tpu.dynamic_rotate %62 by %c112_i32_73 dim 1 : vector<8x128xf32>, i32 -> vector<8x128xf32>
      %c112_i32_74 = arith.constant 112 : i32
      %70 = tpu.dynamic_rotate %66 by %c112_i32_74 dim 1 : vector<8x128xf32>, i32 -> vector<8x128xf32>
      %71 = vector.shape_cast %46 : vector<1x128xi1> to vector<1x128xi1>
      %72 = vector.broadcast %71 : vector<1x128xi1> to vector<8x128xi1>
      %73 = arith.select %72, %69, %70 : vector<8x128xi1>, vector<8x128xf32>
      %c16_i32_75 = arith.constant 16 : i32
      %74 = tpu.dynamic_rotate %62 by %c16_i32_75 dim 1 : vector<8x128xf32>, i32 -> vector<8x128xf32>
      %c16_i32_76 = arith.constant 16 : i32
      %75 = tpu.dynamic_rotate %68 by %c16_i32_76 dim 1 : vector<8x128xf32>, i32 -> vector<8x128xf32>
      %76 = vector.shape_cast %48 : vector<1x128xi1> to vector<1x128xi1>
      %77 = vector.broadcast %76 : vector<1x128xi1> to vector<8x128xi1>
      %78 = arith.select %77, %74, %75 : vector<8x128xi1>, vector<8x128xf32>
      %c96_i32_77 = arith.constant 96 : i32
      %79 = tpu.dynamic_rotate %62 by %c96_i32_77 dim 1 : vector<8x128xf32>, i32 -> vector<8x128xf32>
      %c96_i32_78 = arith.constant 96 : i32
      %80 = tpu.dynamic_rotate %66 by %c96_i32_78 dim 1 : vector<8x128xf32>, i32 -> vector<8x128xf32>
      %81 = vector.shape_cast %50 : vector<1x128xi1> to vector<1x128xi1>
      %82 = vector.broadcast %81 : vector<1x128xi1> to vector<8x128xi1>
      %83 = arith.select %82, %79, %80 : vector<8x128xi1>, vector<8x128xf32>
      %c32_i32_79 = arith.constant 32 : i32
      %84 = tpu.dynamic_rotate %62 by %c32_i32_79 dim 1 : vector<8x128xf32>, i32 -> vector<8x128xf32>
      %c32_i32_80 = arith.constant 32 : i32
      %85 = tpu.dynamic_rotate %68 by %c32_i32_80 dim 1 : vector<8x128xf32>, i32 -> vector<8x128xf32>
      %86 = vector.shape_cast %52 : vector<1x128xi1> to vector<1x128xi1>
      %87 = vector.broadcast %86 : vector<1x128xi1> to vector<8x128xi1>
      %88 = arith.select %87, %84, %85 : vector<8x128xi1>, vector<8x128xf32>
      %c80_i32_81 = arith.constant 80 : i32
      %89 = tpu.dynamic_rotate %62 by %c80_i32_81 dim 1 : vector<8x128xf32>, i32 -> vector<8x128xf32>
      %c80_i32_82 = arith.constant 80 : i32
      %90 = tpu.dynamic_rotate %66 by %c80_i32_82 dim 1 : vector<8x128xf32>, i32 -> vector<8x128xf32>
      %91 = vector.shape_cast %54 : vector<1x128xi1> to vector<1x128xi1>
      %92 = vector.broadcast %91 : vector<1x128xi1> to vector<8x128xi1>
      %93 = arith.select %92, %89, %90 : vector<8x128xi1>, vector<8x128xf32>
      %c48_i32_83 = arith.constant 48 : i32
      %94 = tpu.dynamic_rotate %62 by %c48_i32_83 dim 1 : vector<8x128xf32>, i32 -> vector<8x128xf32>
      %c48_i32_84 = arith.constant 48 : i32
      %95 = tpu.dynamic_rotate %68 by %c48_i32_84 dim 1 : vector<8x128xf32>, i32 -> vector<8x128xf32>
      %96 = vector.shape_cast %56 : vector<1x128xi1> to vector<1x128xi1>
      %97 = vector.broadcast %96 : vector<1x128xi1> to vector<8x128xi1>
      %98 = arith.select %97, %94, %95 : vector<8x128xi1>, vector<8x128xf32>
      %c64_i32_85 = arith.constant 64 : i32
      %99 = tpu.dynamic_rotate %62 by %c64_i32_85 dim 1 : vector<8x128xf32>, i32 -> vector<8x128xf32>
      %c64_i32_86 = arith.constant 64 : i32
      %100 = tpu.dynamic_rotate %66 by %c64_i32_86 dim 1 : vector<8x128xf32>, i32 -> vector<8x128xf32>
      %101 = vector.shape_cast %58 : vector<1x128xi1> to vector<1x128xi1>
      %102 = vector.broadcast %101 : vector<1x128xi1> to vector<8x128xi1>
      %103 = arith.select %102, %99, %100 : vector<8x128xi1>, vector<8x128xf32>
      %c64_i32_87 = arith.constant 64 : i32
      %104 = tpu.dynamic_rotate %62 by %c64_i32_87 dim 1 : vector<8x128xf32>, i32 -> vector<8x128xf32>
      %c64_i32_88 = arith.constant 64 : i32
      %105 = tpu.dynamic_rotate %68 by %c64_i32_88 dim 1 : vector<8x128xf32>, i32 -> vector<8x128xf32>
      %106 = vector.shape_cast %60 : vector<1x128xi1> to vector<1x128xi1>
      %107 = vector.broadcast %106 : vector<1x128xi1> to vector<8x128xi1>
      %108 = arith.select %107, %104, %105 : vector<8x128xi1>, vector<8x128xf32>
      %109 = vector.broadcast %8 : f32 to vector<8x128xf32>
      %110 = arith.mulf %109, %88 : vector<8x128xf32>
      %111 = vector.broadcast %9 : f32 to vector<8x128xf32>
      %112 = arith.mulf %111, %78 : vector<8x128xf32>
      %113 = arith.addf %110, %112 : vector<8x128xf32>
      %114 = vector.broadcast %10 : f32 to vector<8x128xf32>
      %115 = arith.mulf %114, %62 : vector<8x128xf32>
      %116 = arith.addf %113, %115 : vector<8x128xf32>
      %117 = vector.broadcast %11 : f32 to vector<8x128xf32>
      %118 = arith.mulf %117, %73 : vector<8x128xf32>
      %119 = arith.addf %116, %118 : vector<8x128xf32>
      %120 = vector.broadcast %12 : f32 to vector<8x128xf32>
      %121 = arith.mulf %120, %83 : vector<8x128xf32>
      %122 = arith.addf %119, %121 : vector<8x128xf32>
      %c0_89 = arith.constant 0 : index
      %c0_90 = arith.constant 0 : index
      %c0_91 = arith.constant 0 : index
      %c0_92 = arith.constant 0 : index
      %123 = vector.load %arg4[%c0_89, %c0_90, %c0_91, %c0_92] : memref<1x5x16x128xf32, #tpu.memory_space<vmem>>, vector<1x1x8x128xf32>
      %124 = vector.shape_cast %123 : vector<1x1x8x128xf32> to vector<8x128xf32>
      %125 = vector.shape_cast %122 : vector<8x128xf32> to vector<1x1x8x128xf32>
      tpu.vector_store %arg4[%c0_89, %c0_90, %c0_91, %c0_92], %125 {strides = array<i32>} : memref<1x5x16x128xf32, #tpu.memory_space<vmem>>, vector<1x1x8x128xf32>,
      %126 = vector.broadcast %13 : f32 to vector<8x128xf32>
      %127 = arith.mulf %126, %98 : vector<8x128xf32>
      %128 = vector.broadcast %14 : f32 to vector<8x128xf32>
      %129 = arith.mulf %128, %88 : vector<8x128xf32>
      %130 = arith.addf %127, %129 : vector<8x128xf32>
      %131 = vector.broadcast %15 : f32 to vector<8x128xf32>
      %132 = arith.mulf %131, %78 : vector<8x128xf32>
      %133 = arith.addf %130, %132 : vector<8x128xf32>
      %134 = vector.broadcast %16 : f32 to vector<8x128xf32>
      %135 = arith.mulf %134, %62 : vector<8x128xf32>
      %136 = arith.addf %133, %135 : vector<8x128xf32>
      %137 = vector.broadcast %17 : f32 to vector<8x128xf32>
      %138 = arith.mulf %137, %73 : vector<8x128xf32>
      %139 = arith.addf %136, %138 : vector<8x128xf32>
      %140 = vector.broadcast %18 : f32 to vector<8x128xf32>
      %141 = arith.mulf %140, %83 : vector<8x128xf32>
      %142 = arith.addf %139, %141 : vector<8x128xf32>
      %143 = vector.broadcast %19 : f32 to vector<8x128xf32>
      %144 = arith.mulf %143, %93 : vector<8x128xf32>
      %145 = arith.addf %142, %144 : vector<8x128xf32>
      %c0_93 = arith.constant 0 : index
      %c1_94 = arith.constant 1 : index
      %c0_95 = arith.constant 0 : index
      %c0_96 = arith.constant 0 : index
      %146 = vector.load %arg4[%c0_93, %c1_94, %c0_95, %c0_96] : memref<1x5x16x128xf32, #tpu.memory_space<vmem>>, vector<1x1x8x128xf32>
      %147 = vector.shape_cast %146 : vector<1x1x8x128xf32> to vector<8x128xf32>
      %148 = vector.shape_cast %145 : vector<8x128xf32> to vector<1x1x8x128xf32>
      tpu.vector_store %arg4[%c0_93, %c1_94, %c0_95, %c0_96], %148 {strides = array<i32>} : memref<1x5x16x128xf32, #tpu.memory_space<vmem>>, vector<1x1x8x128xf32>,
      %149 = vector.broadcast %20 : f32 to vector<8x128xf32>
      %150 = arith.mulf %149, %98 : vector<8x128xf32>
      %151 = vector.broadcast %21 : f32 to vector<8x128xf32>
      %152 = arith.mulf %151, %88 : vector<8x128xf32>
      %153 = arith.addf %150, %152 : vector<8x128xf32>
      %154 = vector.broadcast %22 : f32 to vector<8x128xf32>
      %155 = arith.mulf %154, %78 : vector<8x128xf32>
      %156 = arith.addf %153, %155 : vector<8x128xf32>
      %157 = vector.broadcast %23 : f32 to vector<8x128xf32>
      %158 = arith.mulf %157, %62 : vector<8x128xf32>
      %159 = arith.addf %156, %158 : vector<8x128xf32>
      %160 = vector.broadcast %24 : f32 to vector<8x128xf32>
      %161 = arith.mulf %160, %73 : vector<8x128xf32>
      %162 = arith.addf %159, %161 : vector<8x128xf32>
      %163 = vector.broadcast %25 : f32 to vector<8x128xf32>
      %164 = arith.mulf %163, %83 : vector<8x128xf32>
      %165 = arith.addf %162, %164 : vector<8x128xf32>
      %166 = vector.broadcast %26 : f32 to vector<8x128xf32>
      %167 = arith.mulf %166, %93 : vector<8x128xf32>
      %168 = arith.addf %165, %167 : vector<8x128xf32>
      %c0_97 = arith.constant 0 : index
      %c2_98 = arith.constant 2 : index
      %c0_99 = arith.constant 0 : index
      %c0_100 = arith.constant 0 : index
      %169 = vector.load %arg4[%c0_97, %c2_98, %c0_99, %c0_100] : memref<1x5x16x128xf32, #tpu.memory_space<vmem>>, vector<1x1x8x128xf32>
      %170 = vector.shape_cast %169 : vector<1x1x8x128xf32> to vector<8x128xf32>
      %171 = vector.shape_cast %168 : vector<8x128xf32> to vector<1x1x8x128xf32>
      tpu.vector_store %arg4[%c0_97, %c2_98, %c0_99, %c0_100], %171 {strides = array<i32>} : memref<1x5x16x128xf32, #tpu.memory_space<vmem>>, vector<1x1x8x128xf32>,
      %172 = vector.broadcast %27 : f32 to vector<8x128xf32>
      %173 = arith.mulf %172, %108 : vector<8x128xf32>
      %174 = vector.broadcast %28 : f32 to vector<8x128xf32>
      %175 = arith.mulf %174, %98 : vector<8x128xf32>
      %176 = arith.addf %173, %175 : vector<8x128xf32>
      %177 = vector.broadcast %29 : f32 to vector<8x128xf32>
      %178 = arith.mulf %177, %88 : vector<8x128xf32>
      %179 = arith.addf %176, %178 : vector<8x128xf32>
      %180 = vector.broadcast %30 : f32 to vector<8x128xf32>
      %181 = arith.mulf %180, %78 : vector<8x128xf32>
      %182 = arith.addf %179, %181 : vector<8x128xf32>
      %183 = vector.broadcast %31 : f32 to vector<8x128xf32>
      %184 = arith.mulf %183, %62 : vector<8x128xf32>
      %185 = arith.addf %182, %184 : vector<8x128xf32>
      %186 = vector.broadcast %32 : f32 to vector<8x128xf32>
      %187 = arith.mulf %186, %73 : vector<8x128xf32>
      %188 = arith.addf %185, %187 : vector<8x128xf32>
      %189 = vector.broadcast %33 : f32 to vector<8x128xf32>
      %190 = arith.mulf %189, %83 : vector<8x128xf32>
      %191 = arith.addf %188, %190 : vector<8x128xf32>
      %192 = vector.broadcast %34 : f32 to vector<8x128xf32>
      %193 = arith.mulf %192, %93 : vector<8x128xf32>
      %194 = arith.addf %191, %193 : vector<8x128xf32>
      %195 = vector.broadcast %35 : f32 to vector<8x128xf32>
      %196 = arith.mulf %195, %103 : vector<8x128xf32>
      %197 = arith.addf %194, %196 : vector<8x128xf32>
      %c0_101 = arith.constant 0 : index
      %c3_102 = arith.constant 3 : index
      %c0_103 = arith.constant 0 : index
      %c0_104 = arith.constant 0 : index
      %198 = vector.load %arg4[%c0_101, %c3_102, %c0_103, %c0_104] : memref<1x5x16x128xf32, #tpu.memory_space<vmem>>, vector<1x1x8x128xf32>
      %199 = vector.shape_cast %198 : vector<1x1x8x128xf32> to vector<8x128xf32>
      %200 = vector.shape_cast %197 : vector<8x128xf32> to vector<1x1x8x128xf32>
      tpu.vector_store %arg4[%c0_101, %c3_102, %c0_103, %c0_104], %200 {strides = array<i32>} : memref<1x5x16x128xf32, #tpu.memory_space<vmem>>, vector<1x1x8x128xf32>,
      %201 = vector.broadcast %36 : f32 to vector<8x128xf32>
      %202 = arith.mulf %201, %108 : vector<8x128xf32>
      %203 = vector.broadcast %37 : f32 to vector<8x128xf32>
      %204 = arith.mulf %203, %98 : vector<8x128xf32>
      %205 = arith.addf %202, %204 : vector<8x128xf32>
      %206 = vector.broadcast %38 : f32 to vector<8x128xf32>
      %207 = arith.mulf %206, %88 : vector<8x128xf32>
      %208 = arith.addf %205, %207 : vector<8x128xf32>
      %209 = vector.broadcast %39 : f32 to vector<8x128xf32>
      %210 = arith.mulf %209, %78 : vector<8x128xf32>
      %211 = arith.addf %208, %210 : vector<8x128xf32>
      %212 = vector.broadcast %40 : f32 to vector<8x128xf32>
      %213 = arith.mulf %212, %62 : vector<8x128xf32>
      %214 = arith.addf %211, %213 : vector<8x128xf32>
      %215 = vector.broadcast %41 : f32 to vector<8x128xf32>
      %216 = arith.mulf %215, %73 : vector<8x128xf32>
      %217 = arith.addf %214, %216 : vector<8x128xf32>
      %218 = vector.broadcast %42 : f32 to vector<8x128xf32>
      %219 = arith.mulf %218, %83 : vector<8x128xf32>
      %220 = arith.addf %217, %219 : vector<8x128xf32>
      %221 = vector.broadcast %43 : f32 to vector<8x128xf32>
      %222 = arith.mulf %221, %93 : vector<8x128xf32>
      %223 = arith.addf %220, %222 : vector<8x128xf32>
      %224 = vector.broadcast %44 : f32 to vector<8x128xf32>
      %225 = arith.mulf %224, %103 : vector<8x128xf32>
      %226 = arith.addf %223, %225 : vector<8x128xf32>
      %c0_105 = arith.constant 0 : index
      %c4_106 = arith.constant 4 : index
      %c0_107 = arith.constant 0 : index
      %c0_108 = arith.constant 0 : index
      %227 = vector.load %arg4[%c0_105, %c4_106, %c0_107, %c0_108] : memref<1x5x16x128xf32, #tpu.memory_space<vmem>>, vector<1x1x8x128xf32>
      %228 = vector.shape_cast %227 : vector<1x1x8x128xf32> to vector<8x128xf32>
      %229 = vector.shape_cast %226 : vector<8x128xf32> to vector<1x1x8x128xf32>
      tpu.vector_store %arg4[%c0_105, %c4_106, %c0_107, %c0_108], %229 {strides = array<i32>} : memref<1x5x16x128xf32, #tpu.memory_space<vmem>>, vector<1x1x8x128xf32>,
      %c0_109 = arith.constant 0 : index
      %c8_110 = arith.constant 8 : index
      %c0_111 = arith.constant 0 : index
      %230 = vector.load %arg2[%c0_109, %c8_110, %c0_111] : memref<1x16x128xf32, #tpu.memory_space<vmem>>, vector<1x8x128xf32>
      %231 = vector.shape_cast %230 : vector<1x8x128xf32> to vector<8x128xf32>
      %c0_112 = arith.constant 0 : index
      %c7_113 = arith.constant 7 : index
      %c0_114 = arith.constant 0 : index
      %232 = vector.load %arg2[%c0_112, %c7_113, %c0_114] : memref<1x16x128xf32, #tpu.memory_space<vmem>>, vector<1x1x128xf32>
      %233 = vector.shape_cast %232 : vector<1x1x128xf32> to vector<1x128xf32>
      %234 = vector.extract_strided_slice %231 {offsets = [1, 0], sizes = [7, 128], strides = [1, 1]} : vector<8x128xf32> to vector<7x128xf32>
      %235 = tpu.concatenate %234, %1 in 0 : vector<7x128xf32>, vector<1x128xf32> -> vector<8x128xf32>
      %236 = vector.extract_strided_slice %231 {offsets = [0, 0], sizes = [7, 128], strides = [1, 1]} : vector<8x128xf32> to vector<7x128xf32>
      %237 = tpu.concatenate %233, %236 in 0 : vector<1x128xf32>, vector<7x128xf32> -> vector<8x128xf32>
      %c112_i32_115 = arith.constant 112 : i32
      %238 = tpu.dynamic_rotate %231 by %c112_i32_115 dim 1 : vector<8x128xf32>, i32 -> vector<8x128xf32>
      %c112_i32_116 = arith.constant 112 : i32
      %239 = tpu.dynamic_rotate %235 by %c112_i32_116 dim 1 : vector<8x128xf32>, i32 -> vector<8x128xf32>
      %240 = vector.shape_cast %46 : vector<1x128xi1> to vector<1x128xi1>
      %241 = vector.broadcast %240 : vector<1x128xi1> to vector<8x128xi1>
      %242 = arith.select %241, %238, %239 : vector<8x128xi1>, vector<8x128xf32>
      %c16_i32_117 = arith.constant 16 : i32
      %243 = tpu.dynamic_rotate %231 by %c16_i32_117 dim 1 : vector<8x128xf32>, i32 -> vector<8x128xf32>
      %c16_i32_118 = arith.constant 16 : i32
      %244 = tpu.dynamic_rotate %237 by %c16_i32_118 dim 1 : vector<8x128xf32>, i32 -> vector<8x128xf32>
      %245 = vector.shape_cast %48 : vector<1x128xi1> to vector<1x128xi1>
      %246 = vector.broadcast %245 : vector<1x128xi1> to vector<8x128xi1>
      %247 = arith.select %246, %243, %244 : vector<8x128xi1>, vector<8x128xf32>
      %c96_i32_119 = arith.constant 96 : i32
      %248 = tpu.dynamic_rotate %231 by %c96_i32_119 dim 1 : vector<8x128xf32>, i32 -> vector<8x128xf32>
      %c96_i32_120 = arith.constant 96 : i32
      %249 = tpu.dynamic_rotate %235 by %c96_i32_120 dim 1 : vector<8x128xf32>, i32 -> vector<8x128xf32>
      %250 = vector.shape_cast %50 : vector<1x128xi1> to vector<1x128xi1>
      %251 = vector.broadcast %250 : vector<1x128xi1> to vector<8x128xi1>
      %252 = arith.select %251, %248, %249 : vector<8x128xi1>, vector<8x128xf32>
      %c32_i32_121 = arith.constant 32 : i32
      %253 = tpu.dynamic_rotate %231 by %c32_i32_121 dim 1 : vector<8x128xf32>, i32 -> vector<8x128xf32>
      %c32_i32_122 = arith.constant 32 : i32
      %254 = tpu.dynamic_rotate %237 by %c32_i32_122 dim 1 : vector<8x128xf32>, i32 -> vector<8x128xf32>
      %255 = vector.shape_cast %52 : vector<1x128xi1> to vector<1x128xi1>
      %256 = vector.broadcast %255 : vector<1x128xi1> to vector<8x128xi1>
      %257 = arith.select %256, %253, %254 : vector<8x128xi1>, vector<8x128xf32>
      %c80_i32_123 = arith.constant 80 : i32
      %258 = tpu.dynamic_rotate %231 by %c80_i32_123 dim 1 : vector<8x128xf32>, i32 -> vector<8x128xf32>
      %c80_i32_124 = arith.constant 80 : i32
      %259 = tpu.dynamic_rotate %235 by %c80_i32_124 dim 1 : vector<8x128xf32>, i32 -> vector<8x128xf32>
      %260 = vector.shape_cast %54 : vector<1x128xi1> to vector<1x128xi1>
      %261 = vector.broadcast %260 : vector<1x128xi1> to vector<8x128xi1>
      %262 = arith.select %261, %258, %259 : vector<8x128xi1>, vector<8x128xf32>
      %c48_i32_125 = arith.constant 48 : i32
      %263 = tpu.dynamic_rotate %231 by %c48_i32_125 dim 1 : vector<8x128xf32>, i32 -> vector<8x128xf32>
      %c48_i32_126 = arith.constant 48 : i32
      %264 = tpu.dynamic_rotate %237 by %c48_i32_126 dim 1 : vector<8x128xf32>, i32 -> vector<8x128xf32>
      %265 = vector.shape_cast %56 : vector<1x128xi1> to vector<1x128xi1>
      %266 = vector.broadcast %265 : vector<1x128xi1> to vector<8x128xi1>
      %267 = arith.select %266, %263, %264 : vector<8x128xi1>, vector<8x128xf32>
      %c64_i32_127 = arith.constant 64 : i32
      %268 = tpu.dynamic_rotate %231 by %c64_i32_127 dim 1 : vector<8x128xf32>, i32 -> vector<8x128xf32>
      %c64_i32_128 = arith.constant 64 : i32
      %269 = tpu.dynamic_rotate %235 by %c64_i32_128 dim 1 : vector<8x128xf32>, i32 -> vector<8x128xf32>
      %270 = vector.shape_cast %58 : vector<1x128xi1> to vector<1x128xi1>
      %271 = vector.broadcast %270 : vector<1x128xi1> to vector<8x128xi1>
      %272 = arith.select %271, %268, %269 : vector<8x128xi1>, vector<8x128xf32>
      %c64_i32_129 = arith.constant 64 : i32
      %273 = tpu.dynamic_rotate %231 by %c64_i32_129 dim 1 : vector<8x128xf32>, i32 -> vector<8x128xf32>
      %c64_i32_130 = arith.constant 64 : i32
      %274 = tpu.dynamic_rotate %237 by %c64_i32_130 dim 1 : vector<8x128xf32>, i32 -> vector<8x128xf32>
      %275 = vector.shape_cast %60 : vector<1x128xi1> to vector<1x128xi1>
      %276 = vector.broadcast %275 : vector<1x128xi1> to vector<8x128xi1>
      %277 = arith.select %276, %273, %274 : vector<8x128xi1>, vector<8x128xf32>
      %278 = vector.broadcast %8 : f32 to vector<8x128xf32>
      %279 = arith.mulf %278, %257 : vector<8x128xf32>
      %280 = vector.broadcast %9 : f32 to vector<8x128xf32>
      %281 = arith.mulf %280, %247 : vector<8x128xf32>
      %282 = arith.addf %279, %281 : vector<8x128xf32>
      %283 = vector.broadcast %10 : f32 to vector<8x128xf32>
      %284 = arith.mulf %283, %231 : vector<8x128xf32>
      %285 = arith.addf %282, %284 : vector<8x128xf32>
      %286 = vector.broadcast %11 : f32 to vector<8x128xf32>
      %287 = arith.mulf %286, %242 : vector<8x128xf32>
      %288 = arith.addf %285, %287 : vector<8x128xf32>
      %289 = vector.broadcast %12 : f32 to vector<8x128xf32>
      %290 = arith.mulf %289, %252 : vector<8x128xf32>
      %291 = arith.addf %288, %290 : vector<8x128xf32>
      %c0_131 = arith.constant 0 : index
      %c0_132 = arith.constant 0 : index
      %c8_133 = arith.constant 8 : index
      %c0_134 = arith.constant 0 : index
      %292 = vector.load %arg4[%c0_131, %c0_132, %c8_133, %c0_134] : memref<1x5x16x128xf32, #tpu.memory_space<vmem>>, vector<1x1x8x128xf32>
      %293 = vector.shape_cast %292 : vector<1x1x8x128xf32> to vector<8x128xf32>
      %294 = vector.shape_cast %291 : vector<8x128xf32> to vector<1x1x8x128xf32>
      tpu.vector_store %arg4[%c0_131, %c0_132, %c8_133, %c0_134], %294 {strides = array<i32>} : memref<1x5x16x128xf32, #tpu.memory_space<vmem>>, vector<1x1x8x128xf32>,
      %295 = vector.broadcast %13 : f32 to vector<8x128xf32>
      %296 = arith.mulf %295, %267 : vector<8x128xf32>
      %297 = vector.broadcast %14 : f32 to vector<8x128xf32>
      %298 = arith.mulf %297, %257 : vector<8x128xf32>
      %299 = arith.addf %296, %298 : vector<8x128xf32>
      %300 = vector.broadcast %15 : f32 to vector<8x128xf32>
      %301 = arith.mulf %300, %247 : vector<8x128xf32>
      %302 = arith.addf %299, %301 : vector<8x128xf32>
      %303 = vector.broadcast %16 : f32 to vector<8x128xf32>
      %304 = arith.mulf %303, %231 : vector<8x128xf32>
      %305 = arith.addf %302, %304 : vector<8x128xf32>
      %306 = vector.broadcast %17 : f32 to vector<8x128xf32>
      %307 = arith.mulf %306, %242 : vector<8x128xf32>
      %308 = arith.addf %305, %307 : vector<8x128xf32>
      %309 = vector.broadcast %18 : f32 to vector<8x128xf32>
      %310 = arith.mulf %309, %252 : vector<8x128xf32>
      %311 = arith.addf %308, %310 : vector<8x128xf32>
      %312 = vector.broadcast %19 : f32 to vector<8x128xf32>
      %313 = arith.mulf %312, %262 : vector<8x128xf32>
      %314 = arith.addf %311, %313 : vector<8x128xf32>
      %c0_135 = arith.constant 0 : index
      %c1_136 = arith.constant 1 : index
      %c8_137 = arith.constant 8 : index
      %c0_138 = arith.constant 0 : index
      %315 = vector.load %arg4[%c0_135, %c1_136, %c8_137, %c0_138] : memref<1x5x16x128xf32, #tpu.memory_space<vmem>>, vector<1x1x8x128xf32>
      %316 = vector.shape_cast %315 : vector<1x1x8x128xf32> to vector<8x128xf32>
      %317 = vector.shape_cast %314 : vector<8x128xf32> to vector<1x1x8x128xf32>
      tpu.vector_store %arg4[%c0_135, %c1_136, %c8_137, %c0_138], %317 {strides = array<i32>} : memref<1x5x16x128xf32, #tpu.memory_space<vmem>>, vector<1x1x8x128xf32>,
      %318 = vector.broadcast %20 : f32 to vector<8x128xf32>
      %319 = arith.mulf %318, %267 : vector<8x128xf32>
      %320 = vector.broadcast %21 : f32 to vector<8x128xf32>
      %321 = arith.mulf %320, %257 : vector<8x128xf32>
      %322 = arith.addf %319, %321 : vector<8x128xf32>
      %323 = vector.broadcast %22 : f32 to vector<8x128xf32>
      %324 = arith.mulf %323, %247 : vector<8x128xf32>
      %325 = arith.addf %322, %324 : vector<8x128xf32>
      %326 = vector.broadcast %23 : f32 to vector<8x128xf32>
      %327 = arith.mulf %326, %231 : vector<8x128xf32>
      %328 = arith.addf %325, %327 : vector<8x128xf32>
      %329 = vector.broadcast %24 : f32 to vector<8x128xf32>
      %330 = arith.mulf %329, %242 : vector<8x128xf32>
      %331 = arith.addf %328, %330 : vector<8x128xf32>
      %332 = vector.broadcast %25 : f32 to vector<8x128xf32>
      %333 = arith.mulf %332, %252 : vector<8x128xf32>
      %334 = arith.addf %331, %333 : vector<8x128xf32>
      %335 = vector.broadcast %26 : f32 to vector<8x128xf32>
      %336 = arith.mulf %335, %262 : vector<8x128xf32>
      %337 = arith.addf %334, %336 : vector<8x128xf32>
      %c0_139 = arith.constant 0 : index
      %c2_140 = arith.constant 2 : index
      %c8_141 = arith.constant 8 : index
      %c0_142 = arith.constant 0 : index
      %338 = vector.load %arg4[%c0_139, %c2_140, %c8_141, %c0_142] : memref<1x5x16x128xf32, #tpu.memory_space<vmem>>, vector<1x1x8x128xf32>
      %339 = vector.shape_cast %338 : vector<1x1x8x128xf32> to vector<8x128xf32>
      %340 = vector.shape_cast %337 : vector<8x128xf32> to vector<1x1x8x128xf32>
      tpu.vector_store %arg4[%c0_139, %c2_140, %c8_141, %c0_142], %340 {strides = array<i32>} : memref<1x5x16x128xf32, #tpu.memory_space<vmem>>, vector<1x1x8x128xf32>,
      %341 = vector.broadcast %27 : f32 to vector<8x128xf32>
      %342 = arith.mulf %341, %277 : vector<8x128xf32>
      %343 = vector.broadcast %28 : f32 to vector<8x128xf32>
      %344 = arith.mulf %343, %267 : vector<8x128xf32>
      %345 = arith.addf %342, %344 : vector<8x128xf32>
      %346 = vector.broadcast %29 : f32 to vector<8x128xf32>
      %347 = arith.mulf %346, %257 : vector<8x128xf32>
      %348 = arith.addf %345, %347 : vector<8x128xf32>
      %349 = vector.broadcast %30 : f32 to vector<8x128xf32>
      %350 = arith.mulf %349, %247 : vector<8x128xf32>
      %351 = arith.addf %348, %350 : vector<8x128xf32>
      %352 = vector.broadcast %31 : f32 to vector<8x128xf32>
      %353 = arith.mulf %352, %231 : vector<8x128xf32>
      %354 = arith.addf %351, %353 : vector<8x128xf32>
      %355 = vector.broadcast %32 : f32 to vector<8x128xf32>
      %356 = arith.mulf %355, %242 : vector<8x128xf32>
      %357 = arith.addf %354, %356 : vector<8x128xf32>
      %358 = vector.broadcast %33 : f32 to vector<8x128xf32>
      %359 = arith.mulf %358, %252 : vector<8x128xf32>
      %360 = arith.addf %357, %359 : vector<8x128xf32>
      %361 = vector.broadcast %34 : f32 to vector<8x128xf32>
      %362 = arith.mulf %361, %262 : vector<8x128xf32>
      %363 = arith.addf %360, %362 : vector<8x128xf32>
      %364 = vector.broadcast %35 : f32 to vector<8x128xf32>
      %365 = arith.mulf %364, %272 : vector<8x128xf32>
      %366 = arith.addf %363, %365 : vector<8x128xf32>
      %c0_143 = arith.constant 0 : index
      %c3_144 = arith.constant 3 : index
      %c8_145 = arith.constant 8 : index
      %c0_146 = arith.constant 0 : index
      %367 = vector.load %arg4[%c0_143, %c3_144, %c8_145, %c0_146] : memref<1x5x16x128xf32, #tpu.memory_space<vmem>>, vector<1x1x8x128xf32>
      %368 = vector.shape_cast %367 : vector<1x1x8x128xf32> to vector<8x128xf32>
      %369 = vector.shape_cast %366 : vector<8x128xf32> to vector<1x1x8x128xf32>
      tpu.vector_store %arg4[%c0_143, %c3_144, %c8_145, %c0_146], %369 {strides = array<i32>} : memref<1x5x16x128xf32, #tpu.memory_space<vmem>>, vector<1x1x8x128xf32>,
      %370 = vector.broadcast %36 : f32 to vector<8x128xf32>
      %371 = arith.mulf %370, %277 : vector<8x128xf32>
      %372 = vector.broadcast %37 : f32 to vector<8x128xf32>
      %373 = arith.mulf %372, %267 : vector<8x128xf32>
      %374 = arith.addf %371, %373 : vector<8x128xf32>
      %375 = vector.broadcast %38 : f32 to vector<8x128xf32>
      %376 = arith.mulf %375, %257 : vector<8x128xf32>
      %377 = arith.addf %374, %376 : vector<8x128xf32>
      %378 = vector.broadcast %39 : f32 to vector<8x128xf32>
      %379 = arith.mulf %378, %247 : vector<8x128xf32>
      %380 = arith.addf %377, %379 : vector<8x128xf32>
      %381 = vector.broadcast %40 : f32 to vector<8x128xf32>
      %382 = arith.mulf %381, %231 : vector<8x128xf32>
      %383 = arith.addf %380, %382 : vector<8x128xf32>
      %384 = vector.broadcast %41 : f32 to vector<8x128xf32>
      %385 = arith.mulf %384, %242 : vector<8x128xf32>
      %386 = arith.addf %383, %385 : vector<8x128xf32>
      %387 = vector.broadcast %42 : f32 to vector<8x128xf32>
      %388 = arith.mulf %387, %252 : vector<8x128xf32>
      %389 = arith.addf %386, %388 : vector<8x128xf32>
      %390 = vector.broadcast %43 : f32 to vector<8x128xf32>
      %391 = arith.mulf %390, %262 : vector<8x128xf32>
      %392 = arith.addf %389, %391 : vector<8x128xf32>
      %393 = vector.broadcast %44 : f32 to vector<8x128xf32>
      %394 = arith.mulf %393, %272 : vector<8x128xf32>
      %395 = arith.addf %392, %394 : vector<8x128xf32>
      %c0_147 = arith.constant 0 : index
      %c4_148 = arith.constant 4 : index
      %c8_149 = arith.constant 8 : index
      %c0_150 = arith.constant 0 : index
      %396 = vector.load %arg4[%c0_147, %c4_148, %c8_149, %c0_150] : memref<1x5x16x128xf32, #tpu.memory_space<vmem>>, vector<1x1x8x128xf32>
      %397 = vector.shape_cast %396 : vector<1x1x8x128xf32> to vector<8x128xf32>
      %398 = vector.shape_cast %395 : vector<8x128xf32> to vector<1x1x8x128xf32>
      tpu.vector_store %arg4[%c0_147, %c4_148, %c8_149, %c0_150], %398 {strides = array<i32>} : memref<1x5x16x128xf32, #tpu.memory_space<vmem>>, vector<1x1x8x128xf32>,
    } else {
    }
    return
  }
  func.func @transform_0(%arg0: i32, %arg1: i32) -> (i32, i32, i32) {
    %c0_i32 = arith.constant 0 : i32
    %c0_i32_0 = arith.constant 0 : i32
    %c0_i32_1 = arith.constant 0 : i32
    return %arg0, %c0_i32, %c0_i32_0 : i32, i32, i32
  }
  func.func @transform_1(%arg0: i32, %arg1: i32) -> (i32, i32) {
    %c0_i32 = arith.constant 0 : i32
    %c0_i32_0 = arith.constant 0 : i32
    %c0_i32_1 = arith.constant 0 : i32
    return %c0_i32, %c0_i32_0 : i32, i32
  }
  func.func @transform_2(%arg0: i32, %arg1: i32) -> (i32, i32, i32, i32) {
    %c0_i32 = arith.constant 0 : i32
    %c0_i32_0 = arith.constant 0 : i32
    %c0_i32_1 = arith.constant 0 : i32
    return %arg0, %arg1, %c0_i32, %c0_i32_0 : i32, i32, i32, i32
  }
}

</mosaic_0001>

<bundles_post_ra>
// kernel: multi_scale_forward.1
= control target key start
LH: loop header
LB: loop body
LE: loop exit
PB: predicated region body
PF: predicated region fallthrough
CT: control target
= control target key end

     0   :  { %s1598_s0 = inlined_call_operand.vmem [shape: f32[2,16,128], index: 0, kind: input, shape index: {}]   ;;  %s1599_s1 = inlined_call_operand.vmem [shape: f32[10,9], index: 1, kind: input, shape index: {}]   ;;  %s1600_s2 = inlined_call_operand.vmem [shape: f32[2,10,16,128], index: 2, kind: output, shape index: {}]  }
   0x1   :  { %1608 = sst [smem:[#allocation12_spill]] %s1598_s0 }
   0x2   :  { %1609 = sst [smem:[#allocation13_spill]] %s1599_s1 }
   0x3   :  { %1610 = sst [smem:[#allocation14_spill]] %s1600_s2 }
   0x4   :  { %7 = vsyncpa [#allocation3], 0  ;;  %s1033_s9 = smov 0   ;;  %s1035_s10 = smov 0  }
   0x5   :  { %s1037_s11 = smov 0   ;;  %s1039_s12 = smov 0  }
   0x6   :  { %s1041_s13 = smov 0  }
   0x7 LB: > { %1611 = sst [smem:[#allocation5_spill]] %s994_s11  ;;  %s799_s14 = sadd.s32 4294967295, %s1002_s13   ;;  %s1002_s13 = sphi %s1041_s13, %s13_s13   ;;  %s998_s12 = sphi %s1039_s12, %s1636_s12   ;;  %s994_s11 = sphi %s1037_s11, %s1635_s11   ;;  %s990_s10 = sphi %s1035_s10, %s1634_s10   ;;  %s986_s9 = sphi %s1033_s9, %s1633_s9  }
   0x8   : > { %1612 = sst [smem:[#allocation6_spill]] %s998_s12  ;;  %s22_s15 = sadd.s32 1, %s994_s11 }
   0x9   : > { %1613 = sst [smem:[#allocation7_spill]] %s1002_s13  ;;  %p23_p0 = scmp.ge.s32.totalorder %s22_s15, 2 }
   0xa   : > { %s25_s16 = sadd.s32 1, %s998_s12  ;;  %p801_p1 = scmp.ge.s32.totalorder %s1002_s13, 1 }
   0xb   : > { %p105_p2 = scmp.lt.s32.totalorder %s1002_s13, 5  ;;  %s1638_s15 = smov (%p23_p0, %s22_s15), 0 }
   0xc   : > { %1614 = sst [smem:[#allocation8_spill]] %s1638_s15  ;;  %s1640_s16 = smov (!%p23_p0, %s25_s16), %s998_s12 }
   0xd   : > { %p1066_p3 = pnand %p801_p1, %p105_p2  ;;  %p27_p4 = scmp.ge.s32.totalorder %s1640_s16, 2 }
   0xe   : > { %p1070_p5 = scmp.eq.s32.totalorder %s799_s14, 0  ;;  %s1617_s1 = sld [smem:[#allocation13_spill]] }
   0xf   : > { %p885_p6 = pneg %p1066_p3  ;;  %s1642_s16 = smov (%p27_p4, %s1640_s16), 0 }
  0x10   : > { %1618 = sst [smem:[#allocation9_spill]] %s1642_s16 }
  0x11   : > { %p1083_p7 = pnand %p1070_p5, %p885_p6 }
  0x13   : > { %p947_p9 = pneg %p1083_p7 }
  0x14   : > { %s117_s21 = sshll.u32 %s1617_s1, 4  ;;  %s118_s21 = int_to_ptr.vmem [resolvable:$true] %s117_s21 }
  0x15   : > { %s945_s23 = scalar_lea.vmem %s118_s21, 256  ;;  %p953_p12 = scmp.lt.s32.totalorder %s118_s21, %s118_s21 }
  0x16   : > { %p946_p8 = scmp.ne.s32.totalorder %s118_s21, %s945_s23  ;;  %p954_p13 = scmp.lt.s32.totalorder %s945_s23, %s945_s23 }
  0x18   : > { %p948_p10 = pnand %p947_p9, %p946_p8  ;;  %p955_p0 = por %p954_p13, %p953_p12 }
  0x1a   : > { %p949_p11 = pneg %p948_p10 }
  0x1c   : > { %p956_p1 = pnand %p955_p0, %p949_p11 }
  0x1e   : > { %959 = shalt.err (!%p956_p1)
}
  0x1f   : > { %s1004_s24 = smov [#allocation2]   ;;  %s1005_s25 = smov 128  }
  0x20   : > { %s1006_s26 = smov 8   ;;  %141 = sbr.rel (%p1066_p3) target bundleno = 389 (0x185), region = 28 }
  0x21   : > { %888 = dma.vmem_to_smem (!%p1083_p7), %s118_s21, 256, %s1004_s24, [#allocation3], %s1005_s25, %s1005_s25, %s1006_s26  }
  0x27   : > { %981 = dma.done.wait (%p1070_p5), [#allocation3], 256  }
  0x28   : > { %983 = vsyncadd (%p1070_p5), [#allocation3], 4294967040 }
  0x29   : > { %147 = sfence }
  0x2a   : > { %p169_p2 = scmp.lt.s32.totalorder %s990_s10, 1  ;;  %s174_s27 = smul.u32 5, %s986_s9  ;;  %v185_v0 = vlaneseq }
  0x2b   : > { %s1620_s0 = sld [smem:[#allocation12_spill]]  ;;  %s1621_s2 = sld [smem:[#allocation14_spill]] }
  0x2c   : > { %s1644_s10 = smov (!%p169_p2, %s990_s10), 1  ;;  %v1100_v1 = vand.u32 127, %v185_v0  ;;  %p177_p4 = scmp.lt.s32.totalorder %s174_s27, 9 }
  0x2d   : > { %s879_s28 = sshll.u32 %s1644_s10, 4  ;;  %s880_s4 = smul.u32 20, %s1644_s10 }
  0x2e   : > { %s1646_s27 = smov (!%p177_p4, %s174_s27), 9  ;;  %p810_p3 = scmp.ne.s32.totalorder %s986_s9, 0 }
  0x2f   : > { %s808_s5 = sshll.u32 %s1646_s27, 1  ;;  %s811_s10 = sld [smem:[#allocation2 + $0x84]] (!%p810_p3)  ;;  %vm219_vm0 = vcmask (!%p810_p3), 1040384   ;;  %vm215_vm1 = vcmask (!%p810_p3), 1046528   ;;  %vm204_vm2 = vcmp.ge.s32.totalorder (!%p810_p3), %v1100_v1, 16  ;;  %vm206_vm3 = vcmp.ge.s32.totalorder (!%p810_p3), %v1100_v1, 32 }
  0x30   : > { %s181_s6 = sadd.s32 %s880_s4, %s808_s5  ;;  %190 = sbr.rel (%p810_p3) target bundleno = 201 (0xc9), region = 36  ;;  %vm203_vm4 = vcmp.lt.s32.totalorder (!%p810_p3), %v1100_v1, 112  ;;  %vm205_vm5 = vcmp.lt.s32.totalorder (!%p810_p3), %v1100_v1, 96 }
  0x31   : > { %s1105_s3 = scalar_lea.vmem %s1620_s0, %s879_s28  ;;  %s809_s7 = sshll.u32 %s181_s6, 3 }
  0x32   : > { %s1110_s17 = scalar_lea.vmem %s1621_s2, %s809_s7  ;;  %v1114_v2 = vld [vmem:[%s1105_s3] sm:$0xff] (!%p810_p3)  ;;  %v1117_v3 = vld [vmem:[%s1105_s3 + $0x8] sm:$0xff] (!%p810_p3)  ;;  %s1007_s18 = smov (!%p810_p3), 32  }
  0x33   : > { %1622 = sst [smem:[#allocation10_spill]] %s1110_s17  ;;  %242 = vrot.lane.b32.xlu1 (!%p810_p3), %v1114_v2, %s1007_s18  ;;  %249 = vst [vmem:[%s1110_s17] sm:$0xff] (!%p810_p3), %v1114_v2  ;;  %v217_v4 = vrot.slane (!%p810_p3), %v1114_v2, 7  ;;  %319 = vst [vmem:[%s1110_s17 + $0x8] sm:$0xff] (!%p810_p3), %v1117_v3  ;;  %s1008_s19 = smov (!%p810_p3), 16   ;;  %v296_v5 = vrot.slane (!%p810_p3), %v1117_v3, 7  ;;  %v210_v13 = vrot.slane (!%p810_p3), %v1114_v2, 1 }
  0x34   : > { %228 = vrot.lane.b32.xlu0 (!%p810_p3), %v1114_v2, %s1008_s19  ;;  %v291_v7 = vld [vmem:[%s1105_s3 + $0x7] sm:$0x1] (!%p810_p3)  ;;  %v208_v12 = vld [vmem:[%s1105_s3 + $0x8] sm:$0x1] (!%p810_p3)  ;;  %v293_v16 = vrot.slane (!%p810_p3), %v1117_v3, 1  ;;  %s1009_s20 = smov (!%p810_p3), 112  }
  0x35   : > { %v220_v6 = vsel (!%p810_p3), %vm219_vm0, 0.0, %v217_v4  ;;  %v250_v8 = vstv (!%p810_p3), %s811_s10  ;;  %v298_v9 = vsel (!%p810_p3), %vm219_vm0, %v291_v7, %v296_v5  ;;  %v213_v14 = vrot.slane (!%p810_p3), %v208_v12, 1  ;;  %s1010_s21 = smov (!%p810_p3), 96   ;;  %s1141_s22 = sld [smem:[#allocation2 + $0x103]] (!%p810_p3) }
  0x36   : > { %v251_v10 = vmul.f32 (!%p810_p3), %v250_v8, %v1114_v2  ;;  %v320_v11 = vmul.f32 (!%p810_p3), %v1117_v3, %v250_v8  ;;  %v295_v17 = vsel (!%p810_p3), %vm215_vm1, %v293_v16, 0.0  ;;  %s1143_s23 = sld [smem:[#allocation2 + $0x104]] (!%p810_p3)  ;;  %s1145_s24 = sld [smem:[#allocation2 + $0x183]] (!%p810_p3) }
  0x37   : > { %244 = vrot.lane.b32.xlu1 %v220_v6, %s1007_s18  ;;  %v216_v15 = vsel %vm215_vm1, %v210_v13, %v213_v14  ;;  %s1147_s25 = sld [smem:[#allocation2 + $0x184]]  ;;  %s1149_s26 = sld [smem:[#allocation2 + $0x202]] }
  0x38   : > { %230 = vrot.lane.b32.xlu0 %v220_v6, %s1008_s19  ;;  %823 = vst [vmem:[%s1110_s17 + $0x10] sm:$0xff] %v251_v10  ;;  %827 = vst [vmem:[%s1110_s17 + $0x18] sm:$0xff] %v320_v11  ;;  %s1151_s27 = sld [smem:[#allocation2 + $0x203]]  ;;  %s1154_s28 = sld [smem:[#allocation2 + $0x105]] }
  0x39   : > { %s1156_s29 = sld [smem:[#allocation2 + $0x185]]  ;;  %s1158_s30 = sld [smem:[#allocation2 + $0x204]] }
  0x3a   : > { %s1167_s4 = sld [smem:[#allocation2 + $0x205]]  ;;  %s1181_s5 = sld [smem:[#allocation2 + $0x206]] }
  0x3b   : > { %306 = vrot.lane.b32.xlu1 %v298_v9, %s1008_s19  ;;  %v254_v25 = vstv %s1141_s22 }
  0x3c   : > { %304 = vrot.lane.b32.xlu0 %v1117_v3, %s1008_s19  ;;  %v256_v26 = vstv %s1143_s23  ;;  %v264_v27 = vstv %s1145_s24 }
  0x3d   : > { %v266_v28 = vstv %s1147_s25  ;;  %v274_v30 = vstv %s1149_s26  ;;  %v257_v34 = vmul.f32 %v256_v26, %v1114_v2  ;;  %v323_v39 = vmul.f32 %v1117_v3, %v256_v26 }
  0x3e   : > { %v276_v35 = vstv %s1151_s27  ;;  %v267_v37 = vmul.f32 %v266_v28, %v1114_v2  ;;  %v259_v41 = vstv %s1154_s28  ;;  %v329_v45 = vmul.f32 %v1117_v3, %v266_v28 }
  0x3f   : > { %316 = vrot.lane.b32.xlu1 %v298_v9, %s1007_s18  ;;  %v269_v42 = vstv %s1156_s29  ;;  %v279_v46 = vstv %s1158_s30 }
  0x40   : > { %314 = vrot.lane.b32.xlu0 %v1117_v3, %s1007_s18  ;;  %v280_v56 = vmul.f32 %v279_v46, %v1114_v2  ;;  %v282_v57 = vstv %s1167_s4  ;;  %v337_v9 = vmul.f32 %v1117_v3, %v279_v46  ;;  %v285_v11 = vstv %s1181_s5 }
  0x43   : > { %223 = vrot.lane.b32.xlu1 %v216_v15, %s1009_s20 }
  0x44   : > { %221 = vrot.lane.b32.xlu0 %v1114_v2, %s1009_s20 }
  0x47   : > { %301 = vrot.lane.b32.xlu1 %v295_v17, %s1009_s20 }
  0x48   : > { %299 = vrot.lane.b32.xlu0 %v1117_v3, %s1009_s20 }
  0x4b   : > { %237 = vrot.lane.b32.xlu1 %v216_v15, %s1010_s21 }
  0x4c   : > { %235 = vrot.lane.b32.xlu0 %v1114_v2, %s1010_s21 }
  0x4f   : > { %311 = vrot.lane.b32.xlu1 %v295_v17, %s1010_s21 }
  0x50   : > { %309 = vrot.lane.b32.xlu0 %v1117_v3, %s1010_s21 }
  0xa5   : > { %v243_v18 = vpop.permute.xlu1 %242 }
  0xa6   : > { %v229_v19 = vpop.permute.xlu0 %228 }
  0xa9   : > { %v245_v20 = vpop.permute.xlu1 %244 }
  0xaa   : > { %v231_v21 = vpop.permute.xlu0 %230  ;;  %v248_v32 = vsel %vm206_vm3, %v243_v18, %v245_v20 }
  0xab   : > { %v234_v24 = vsel %vm204_vm2, %v229_v19, %v231_v21  ;;  %v275_v43 = vmul.f32 %v274_v30, %v248_v32 }
  0xac   : > { %v255_v33 = vmul.f32 %v254_v25, %v234_v24  ;;  %v265_v36 = vmul.f32 %v264_v27, %v234_v24  ;;  %v277_v44 = vmul.f32 %v276_v35, %v234_v24 }
  0xad   : > { %v307_v22 = vpop.permute.xlu1 %306 }
  0xae   : > { %v305_v23 = vpop.permute.xlu0 %304  ;;  %v258_v48 = vadd.f32 %v257_v34, %v255_v33  ;;  %v268_v52 = vadd.f32 %v267_v37, %v265_v36  ;;  %v278_v59 = vadd.f32 %v277_v44, %v275_v43 }
  0xaf   : > { %v308_v38 = vsel %vm204_vm2, %v305_v23, %v307_v22 }
  0xb0   : > { %v322_v49 = vmul.f32 %v308_v38, %v254_v25  ;;  %v328_v53 = vmul.f32 %v308_v38, %v264_v27  ;;  %v335_v4 = vmul.f32 %v308_v38, %v276_v35  ;;  %v281_v13 = vadd.f32 %v280_v56, %v278_v59 }
  0xb1   : > { %v317_v29 = vpop.permute.xlu1 %316 }
  0xb2   : > { %v315_v31 = vpop.permute.xlu0 %314  ;;  %v324_v0 = vadd.f32 %v323_v39, %v322_v49  ;;  %v330_v6 = vadd.f32 %v329_v45, %v328_v53 }
  0xb3   : > { %v318_v50 = vsel %vm206_vm3, %v315_v31, %v317_v29 }
  0xb4   : > { %v334_v60 = vmul.f32 %v318_v50, %v274_v30 }
  0xb5   : > { %v224_v40 = vpop.permute.xlu1 %223 }
  0xb6   : > { %v222_v47 = vpop.permute.xlu0 %221  ;;  %v336_v12 = vadd.f32 %v335_v4, %v334_v60 }
  0xb7   : > { %v227_v51 = vsel %vm203_vm4, %v222_v47, %v224_v40 }
  0xb8   : > { %v260_v54 = vmul.f32 %v259_v41, %v227_v51  ;;  %v270_v55 = vmul.f32 %v269_v42, %v227_v51  ;;  %v283_v2 = vmul.f32 %v282_v57, %v227_v51  ;;  %v338_v22 = vadd.f32 %v337_v9, %v336_v12 }
  0xb9   : > { %v302_v58 = vpop.permute.xlu1 %301 }
  0xba   : > { %v261_v61 = vadd.f32 %v260_v54, %v258_v48  ;;  %v271_v62 = vadd.f32 %v270_v55, %v268_v52  ;;  %v300_v63 = vpop.permute.xlu0 %299  ;;  %v284_v18 = vadd.f32 %v283_v2, %v281_v13 }
  0xbb   : > { %v303_v5 = vsel %vm203_vm4, %v300_v63, %v302_v58 }
  0xbc   : > { %824 = vst [vmem:[%s1110_s17 + $0x20] sm:$0xff] %v261_v61  ;;  %825 = vst [vmem:[%s1110_s17 + $0x30] sm:$0xff] %v271_v62  ;;  %v325_v7 = vmul.f32 %v303_v5, %v259_v41  ;;  %v331_v8 = vmul.f32 %v303_v5, %v269_v42  ;;  %v339_v19 = vmul.f32 %v303_v5, %v282_v57 }
  0xbd   : > { %v238_v10 = vpop.permute.xlu1 %237 }
  0xbe   : > { %v326_v14 = vadd.f32 %v325_v7, %v324_v0  ;;  %v332_v15 = vadd.f32 %v331_v8, %v330_v6  ;;  %v236_v16 = vpop.permute.xlu0 %235  ;;  %v340_v25 = vadd.f32 %v339_v19, %v338_v22 }
  0xbf   : > { %v241_v17 = vsel %vm205_vm5, %v236_v16, %v238_v10 }
  0xc0   : > { %828 = vst [vmem:[%s1110_s17 + $0x28] sm:$0xff] %v326_v14  ;;  %829 = vst [vmem:[%s1110_s17 + $0x38] sm:$0xff] %v332_v15  ;;  %v286_v20 = vmul.f32 %v285_v11, %v241_v17 }
  0xc1   : > { %v312_v21 = vpop.permute.xlu1 %311 }
  0xc2   : > { %v287_v3 = vadd.f32 %v286_v20, %v284_v18  ;;  %v310_v23 = vpop.permute.xlu0 %309 }
  0xc3   : > { %v313_v24 = vsel %vm205_vm5, %v310_v23, %v312_v21 }
  0xc4   : > { %826 = vst [vmem:[%s1110_s17 + $0x40] sm:$0xff] %v287_v3  ;;  %v341_v26 = vmul.f32 %v313_v24, %v285_v11 }
  0xc6   : > { %v342_v27 = vadd.f32 %v341_v26, %v340_v25 }
  0xc8   : > { %830 = vst [vmem:[%s1110_s17 + $0x48] sm:$0xff] %v342_v27 }
  0xc9 PF: > { %p831_p5 = scmp.ne.s32.totalorder %s986_s9, 1 }
  0xcb   : > { %347 = sbr.rel (%p831_p5) target bundleno = 389 (0x185), region = 40 }
  0xd2   : > { %v1208_v28 = vld [vmem:[%s1105_s3] sm:$0xff]  ;;  %vm405_vm6 = vcmask 1040384   ;;  %v1211_v29 = vld [vmem:[%s1105_s3 + $0x8] sm:$0xff]  ;;  %s1011_s6 = smov 64   ;;  %s1012_s7 = smov 48   ;;  %vm401_vm7 = vcmask 1046528  }
  0xd3   : > { %449 = vrot.lane.b32.xlu1 %v1208_v28, %s1011_s6  ;;  %442 = vrot.lane.b32.xlu0 %v1208_v28, %s1012_s7  ;;  %v403_v30 = vrot.slane %v1208_v28, 7  ;;  %v582_v31 = vrot.slane %v1211_v29, 7  ;;  %v577_v33 = vld [vmem:[%s1105_s3 + $0x7] sm:$0x1]  ;;  %s1013_s9 = smov 32   ;;  %s1014_s8 = smov 16  }
  0xd4   : > { %v394_v35 = vld [vmem:[%s1105_s3 + $0x8] sm:$0x1]  ;;  %v396_v36 = vrot.slane %v1208_v28, 1  ;;  %v579_v39 = vrot.slane %v1211_v29, 1  ;;  %s1015_s14 = smov 112   ;;  %s1016_s3 = smov 96  }
  0xd5   : > { %v406_v32 = vsel %vm405_vm6, 0.0, %v403_v30  ;;  %v584_v34 = vsel %vm405_vm6, %v577_v33, %v582_v31  ;;  %v399_v37 = vrot.slane %v394_v35, 1  ;;  %s1017_s10 = smov 80   ;;  %s1239_s18 = sld [smem:[#allocation2 + $0x400]]  ;;  %vm392_vm8 = vcmp.ge.s32.totalorder %v1100_v1, 64 }
  0xd6   : > { %v581_v40 = vsel %vm401_vm7, %v579_v39, 0.0  ;;  %s1245_s19 = sld [smem:[#allocation2 + $0x480]]  ;;  %s1247_s20 = sld [smem:[#allocation2 + $0x301]]  ;;  %vm390_vm9 = vcmp.ge.s32.totalorder %v1100_v1, 48  ;;  %vm388_vm10 = vcmp.ge.s32.totalorder %v1100_v1, 32  ;;  %vm386_vm11 = vcmp.ge.s32.totalorder %v1100_v1, 16 }
  0xd7   : > { %456 = vrot.lane.b32.xlu1 %v406_v32, %s1011_s6  ;;  %444 = vrot.lane.b32.xlu0 %v406_v32, %s1012_s7  ;;  %v402_v38 = vsel %vm401_vm7, %v396_v36, %v399_v37  ;;  %s1249_s21 = sld [smem:[#allocation2 + $0x381]]  ;;  %s1255_s24 = sld [smem:[#allocation2 + $0x282]]  ;;  %vm385_vm12 = vcmp.lt.s32.totalorder %v1100_v1, 112  ;;  %vm387_vm13 = vcmp.lt.s32.totalorder %v1100_v1, 96  ;;  %vm389_vm14 = vcmp.lt.s32.totalorder %v1100_v1, 80 }
  0xd8   : > { %s1251_s22 = sld [smem:[#allocation2 + $0x401]]  ;;  %s1257_s25 = sld [smem:[#allocation2 + $0x302]]  ;;  %vm391_vm15 = vcmp.lt.s32.totalorder %v1100_v1, 64 }
  0xd9   : > { %s1253_s23 = sld [smem:[#allocation2 + $0x481]]  ;;  %s1259_s26 = sld [smem:[#allocation2 + $0x382]] }
  0xda   : > { %s1265_s27 = sld [smem:[#allocation2 + $0x402]]  ;;  %s1269_s29 = sld [smem:[#allocation2 + $0x283]] }
  0xdb   : > { %612 = vrot.lane.b32.xlu1 %v584_v34, %s1012_s7  ;;  %610 = vrot.lane.b32.xlu0 %v1211_v29, %s1012_s7  ;;  %s1267_s28 = sld [smem:[#allocation2 + $0x482]]  ;;  %s1271_s30 = sld [smem:[#allocation2 + $0x284]]  ;;  %v520_v47 = vstv %s1239_s18 }
  0xdc   : > { %s1273_s4 = sld [smem:[#allocation2 + $0x304]]  ;;  %s1296_s0 = sld [smem:[#allocation2 + $0x305]]  ;;  %v548_v48 = vstv %s1245_s19  ;;  %v476_v49 = vstv %s1247_s20 }
  0xdd   : > { %1623 = sst [smem:[#allocation11_spill]] %s1255_s24  ;;  %s1275_s5 = sld [smem:[#allocation2 + $0x384]]  ;;  %v498_v52 = vstv %s1249_s21  ;;  %v461_v55 = vstv %s1255_s24 }
  0xde   : > { %s1279_s7 = sld [smem:[#allocation2 + $0x484]]  ;;  %s1298_s1 = sld [smem:[#allocation2 + $0x385]]  ;;  %v522_v53 = vstv %s1251_s22  ;;  %v478_v56 = vstv %s1257_s25 }
  0xdf   : > { %620 = vrot.lane.b32.xlu1 %v584_v34, %s1011_s6  ;;  %615 = vrot.lane.b32.xlu0 %v1211_v29, %s1011_s6  ;;  %s1306_s2 = sld [smem:[#allocation2 + $0x405]]  ;;  %v550_v54 = vstv %s1253_s23  ;;  %s1315_s15 = sld [smem:[#allocation2 + $0x286]]  ;;  %v500_v57 = vstv %s1259_s26 }
  0xe0   : > { %s1308_s16 = sld [smem:[#allocation2 + $0x485]]  ;;  %s1317_s12 = sld [smem:[#allocation2 + $0x306]]  ;;  %v525_v60 = vstv %s1265_s27  ;;  %v463_v6 = vstv %s1269_s29 }
  0xe1   : > { %v466_v58 = vstv %s1271_s30  ;;  %s1323_s11 = sld [smem:[#allocation2 + $0x386]]  ;;  %s1333_s24 = sld [smem:[#allocation2 + $0x307]]  ;;  %v553_v5 = vstv %s1267_s28 }
  0xe2   : > { %v484_v59 = vstv %s1273_s4  ;;  %s1325_s13 = sld [smem:[#allocation2 + $0x406]]  ;;  %s1340_s30 = sld [smem:[#allocation2 + $0x387]]  ;;  %v1347_v10 = vmul.f32 %v466_v58, %v1208_v28  ;;  %v487_v18 = vstv %s1296_s0  ;;  %v1376_v3 = vmul.f32 %v1211_v29, %v466_v58 }
  0xe3   : > { %430 = vrot.lane.b32.xlu1 %v406_v32, %s1013_s9  ;;  %428 = vrot.lane.b32.xlu0 %v1208_v28, %s1013_s9  ;;  %v506_v61 = vstv %s1275_s5  ;;  %s1331_s17 = sld [smem:[#allocation2 + $0x486]]  ;;  %s1342_s4 = sld [smem:[#allocation2 + $0x407]]  ;;  %v1350_v11 = vmul.f32 %v484_v59, %v1208_v28  ;;  %v1379_v23 = vmul.f32 %v1211_v29, %v484_v59 }
  0xe4   : > { %v559_v63 = vstv %s1279_s7  ;;  %s1352_s5 = sld [smem:[#allocation2 + $0x487]]  ;;  %v1356_v13 = vmul.f32 %v506_v61, %v1208_v28  ;;  %v509_v19 = vstv %s1298_s1  ;;  %v1382_v24 = vmul.f32 %v1211_v29, %v506_v61  ;;  %s1625_s18 = sld [smem:[#allocation10_spill]] }
  0xe5   : > { %v1362_v15 = vmul.f32 %v559_v63, %v1208_v28  ;;  %v534_v22 = vstv %s1306_s2  ;;  %v1389_v27 = vmul.f32 %v1211_v29, %v559_v63  ;;  %s1532_s0 = sld [smem:[#allocation2 + $0x408]] }
  0xe6   : > { %v562_v25 = vstv %s1308_s16  ;;  %v490_v33 = vstv %s1317_s12  ;;  %s1534_s1 = sld [smem:[#allocation2 + $0x488]] }
  0xe7   : > { %602 = vrot.lane.b32.xlu1 %v584_v34, %s1013_s9  ;;  %600 = vrot.lane.b32.xlu0 %v1211_v29, %s1013_s9  ;;  %s1285_s9 = sld [smem:[#allocation2 + $0x303]]  ;;  %v493_v36 = vstv %s1333_s24 }
  0xe9   : > { %v565_v35 = vstv %s1331_s17 }
  0xeb   : > { %416 = vrot.lane.b32.xlu1 %v406_v32, %s1014_s8  ;;  %414 = vrot.lane.b32.xlu0 %v1208_v28, %s1014_s8 }
  0xed   : > { %v481_v2 = vstv %s1285_s9 }
  0xef   : > { %592 = vrot.lane.b32.xlu1 %v584_v34, %s1014_s8  ;;  %590 = vrot.lane.b32.xlu0 %v1211_v29, %s1014_s8  ;;  %s1287_s8 = sld [smem:[#allocation2 + $0x383]]  ;;  %v512_v34 = vstv %s1323_s11 }
  0xf3   : > { %407 = vrot.lane.b32.xlu0 %v1208_v28, %s1015_s14  ;;  %409 = vrot.lane.b32.xlu1 %v402_v38, %s1015_s14 }
  0xf5   : > { %v503_v7 = vstv %s1287_s8 }
  0xf7   : > { %585 = vrot.lane.b32.xlu0 %v1211_v29, %s1015_s14  ;;  %587 = vrot.lane.b32.xlu1 %v581_v40, %s1015_s14  ;;  %s1289_s14 = sld [smem:[#allocation2 + $0x403]] }
  0xfb   : > { %421 = vrot.lane.b32.xlu0 %v1208_v28, %s1016_s3  ;;  %423 = vrot.lane.b32.xlu1 %v402_v38, %s1016_s3 }
  0xfd   : > { %v528_v8 = vstv %s1289_s14 }
  0xff   : > { %595 = vrot.lane.b32.xlu0 %v1211_v29, %s1016_s3  ;;  %597 = vrot.lane.b32.xlu1 %v581_v40, %s1016_s3  ;;  %s1291_s3 = sld [smem:[#allocation2 + $0x483]] }
 0x103   : > { %435 = vrot.lane.b32.xlu0 %v1208_v28, %s1017_s10  ;;  %437 = vrot.lane.b32.xlu1 %v402_v38, %s1017_s10 }
 0x105   : > { %v556_v9 = vstv %s1291_s3 }
 0x107   : > { %605 = vrot.lane.b32.xlu0 %v1211_v29, %s1017_s10  ;;  %607 = vrot.lane.b32.xlu1 %v581_v40, %s1017_s10  ;;  %s1293_s10 = sld [smem:[#allocation2 + $0x285]] }
 0x10b   : > { %451 = vrot.lane.b32.xlu0 %v402_v38, %s1011_s6  ;;  %617 = vrot.lane.b32.xlu1 %v581_v40, %s1011_s6  ;;  %s1277_s6 = sld [smem:[#allocation2 + $0x404]] }
 0x10d   : > { %v469_v12 = vstv %s1293_s10 }
 0x111   : > { %v531_v62 = vstv %s1277_s6 }
 0x112   : > { %v1359_v14 = vmul.f32 %v531_v62, %v1208_v28  ;;  %v1386_v26 = vmul.f32 %v1211_v29, %v531_v62  ;;  %v472_v28 = vstv %s1315_s15  ;;  %v537_v29 = vstv %s1325_s13 }
 0x145   : > { %v1241_v41 = vpop.permute.xlu1 %449  ;;  %v1243_v42 = vpop.permute.xlu0 %442 }
 0x149   : > { %v1261_v43 = vpop.permute.xlu1 %456  ;;  %v1263_v44 = vpop.permute.xlu0 %444 }
 0x14a   : > { %v460_v16 = vsel %vm392_vm8, %v1241_v41, %v1261_v43  ;;  %v448_v17 = vsel %vm390_vm9, %v1243_v42, %v1263_v44 }
 0x14b   : > { %v521_v30 = vmul.f32 %v520_v47, %v460_v16  ;;  %v523_v31 = vmul.f32 %v522_v53, %v448_v17  ;;  %v549_v44 = vmul.f32 %v548_v48, %v460_v16  ;;  %v477_v58 = vmul.f32 %v476_v49, %v448_v17 }
 0x14c   : > { %v499_v59 = vmul.f32 %v498_v52, %v448_v17 }
 0x14d   : > { %v1281_v45 = vpop.permute.xlu1 %612  ;;  %v1283_v46 = vpop.permute.xlu0 %610  ;;  %v524_v61 = vadd.f32 %v523_v31, %v521_v30 }
 0x14e   : > { %v614_v37 = vsel %vm390_vm9, %v1283_v46, %v1281_v45 }
 0x14f   : > { %v662_v63 = vmul.f32 %v614_v37, %v522_v53  ;;  %v680_v16 = vmul.f32 %v614_v37, %v550_v54  ;;  %v647_v43 = vmul.f32 %v614_v37, %v498_v52 }
 0x151   : > { %v621_v50 = vpop.permute.xlu1 %620  ;;  %v1304_v51 = vpop.permute.xlu0 %615 }
 0x152   : > { %v622_v32 = vsel %vm392_vm8, %v1304_v51, %v621_v50  ;;  %v551_v50 = vmul.f32 %v550_v54, %v448_v17 }
 0x153   : > { %v661_v45 = vmul.f32 %v622_v32, %v520_v47  ;;  %v679_v62 = vmul.f32 %v622_v32, %v548_v48  ;;  %v633_v32 = vmul.f32 %v614_v37, %v476_v49 }
 0x154   : > { %v552_v31 = vadd.f32 %v551_v50, %v549_v44 }
 0x155   : > { %v431_v0 = vpop.permute.xlu1 %430  ;;  %v429_v4 = vpop.permute.xlu0 %428  ;;  %v681_v54 = vadd.f32 %v680_v16, %v679_v62 }
 0x156   : > { %v434_v38 = vsel %vm388_vm10, %v429_v4, %v431_v0 }
 0x157   : > { %v479_v0 = vmul.f32 %v478_v56, %v434_v38  ;;  %v501_v4 = vmul.f32 %v500_v57, %v434_v38  ;;  %v526_v46 = vmul.f32 %v525_v60, %v434_v38  ;;  %v554_v17 = vmul.f32 %v553_v5, %v434_v38 }
 0x159   : > { %v603_v20 = vpop.permute.xlu1 %602  ;;  %v601_v21 = vpop.permute.xlu0 %600  ;;  %v502_v44 = vadd.f32 %v501_v4, %v499_v59  ;;  %v527_v37 = vadd.f32 %v526_v46, %v524_v61 }
 0x15a   : > { %v604_v48 = vsel %vm388_vm10, %v601_v21, %v603_v20  ;;  %v480_v21 = vadd.f32 %v479_v0, %v477_v58 }
 0x15b   : > { %v634_v49 = vmul.f32 %v604_v48, %v478_v56  ;;  %v648_v58 = vmul.f32 %v604_v48, %v500_v57  ;;  %v664_v59 = vmul.f32 %v604_v48, %v525_v60  ;;  %v682_v56 = vmul.f32 %v604_v48, %v553_v5 }
 0x15c   : > { %v623_v46 = vmul.f32 %v604_v48, %v461_v55 }
 0x15d   : > { %v417_v39 = vpop.permute.xlu1 %416  ;;  %v415_v40 = vpop.permute.xlu0 %414  ;;  %v649_v48 = vadd.f32 %v648_v58, %v647_v43 }
 0x15e   : > { %v420_v47 = vsel %vm386_vm11, %v415_v40, %v417_v39  ;;  %v663_v39 = vadd.f32 %v662_v63, %v661_v45  ;;  %v462_v40 = vmul.f32 %v461_v55, %v434_v38  ;;  %v555_v38 = vadd.f32 %v554_v17, %v552_v31 }
 0x15f   : > { %v464_v42 = vmul.f32 %v463_v6, %v420_v47  ;;  %v482_v20 = vmul.f32 %v481_v2, %v420_v47  ;;  %v504_v50 = vmul.f32 %v503_v7, %v420_v47  ;;  %v529_v45 = vmul.f32 %v528_v8, %v420_v47 }
 0x160   : > { %v557_v0 = vmul.f32 %v556_v9, %v420_v47  ;;  %v635_v17 = vadd.f32 %v634_v49, %v633_v32  ;;  %v683_v32 = vadd.f32 %v682_v56, %v681_v54 }
 0x161   : > { %v593_v53 = vpop.permute.xlu1 %592  ;;  %v591_v30 = vpop.permute.xlu0 %590  ;;  %v465_v61 = vadd.f32 %v464_v42, %v462_v40  ;;  %v483_v4 = vadd.f32 %v482_v20, %v480_v21  ;;  %v505_v60 = vadd.f32 %v504_v50, %v502_v44  ;;  %v530_v31 = vadd.f32 %v529_v45, %v527_v37 }
 0x162   : > { %v594_v52 = vsel %vm386_vm11, %v591_v30, %v593_v53  ;;  %v558_v40 = vadd.f32 %v557_v0, %v555_v38 }
 0x163   : > { %v624_v16 = vmul.f32 %v594_v52, %v463_v6  ;;  %v636_v53 = vmul.f32 %v594_v52, %v481_v2  ;;  %v650_v30 = vmul.f32 %v594_v52, %v503_v7  ;;  %v666_v5 = vmul.f32 %v594_v52, %v528_v8 }
 0x164   : > { %v684_v55 = vmul.f32 %v594_v52, %v556_v9  ;;  %v665_v6 = vadd.f32 %v664_v59, %v663_v39  ;;  %v468_v7 = vadd.f32 %v1347_v10, %v465_v61  ;;  %v486_v21 = vadd.f32 %v1350_v11, %v483_v4 }
 0x165   : > { %v408_v62 = vpop.permute.xlu0 %407  ;;  %v410_v63 = vpop.permute.xlu1 %409  ;;  %v625_v2 = vadd.f32 %v624_v16, %v623_v46  ;;  %v637_v8 = vadd.f32 %v636_v53, %v635_v17  ;;  %v651_v9 = vadd.f32 %v650_v30, %v649_v48  ;;  %v508_v10 = vadd.f32 %v1356_v13, %v505_v60 }
 0x166   : > { %v413_v57 = vsel %vm385_vm12, %v408_v62, %v410_v63  ;;  %v667_v54 = vadd.f32 %v666_v5, %v665_v6  ;;  %v685_v44 = vadd.f32 %v684_v55, %v683_v32  ;;  %v533_v49 = vadd.f32 %v1359_v14, %v530_v31 }
 0x167   : > { %v470_v20 = vmul.f32 %v469_v12, %v413_v57  ;;  %v488_v43 = vmul.f32 %v487_v18, %v413_v57  ;;  %v510_v37 = vmul.f32 %v509_v19, %v413_v57  ;;  %v535_v38 = vmul.f32 %v534_v22, %v413_v57 }
 0x168   : > { %v561_v50 = vadd.f32 %v1362_v15, %v558_v40  ;;  %v563_v63 = vmul.f32 %v562_v25, %v413_v57  ;;  %v627_v59 = vadd.f32 %v1376_v3, %v625_v2  ;;  %v639_v56 = vadd.f32 %v1379_v23, %v637_v8 }
 0x169   : > { %v586_v42 = vpop.permute.xlu0 %585  ;;  %v588_v47 = vpop.permute.xlu1 %587  ;;  %v471_v62 = vadd.f32 %v470_v20, %v468_v7  ;;  %v489_v58 = vadd.f32 %v488_v43, %v486_v21  ;;  %v653_v15 = vadd.f32 %v1382_v24, %v651_v9  ;;  %v511_v17 = vadd.f32 %v510_v37, %v508_v10 }
 0x16a   : > { %v589_v39 = vsel %vm385_vm12, %v586_v42, %v588_v47  ;;  %v536_v53 = vadd.f32 %v535_v38, %v533_v49  ;;  %v669_v3 = vadd.f32 %v1386_v26, %v667_v54  ;;  %v564_v24 = vadd.f32 %v563_v63, %v561_v50 }
 0x16b   : > { %v628_v13 = vmul.f32 %v589_v39, %v469_v12  ;;  %v640_v0 = vmul.f32 %v589_v39, %v487_v18  ;;  %v654_v46 = vmul.f32 %v589_v39, %v509_v19  ;;  %v670_v61 = vmul.f32 %v589_v39, %v534_v22 }
 0x16c   : > { %v687_v26 = vadd.f32 %v1389_v27, %v685_v44  ;;  %v688_v57 = vmul.f32 %v589_v39, %v562_v25  ;;  %v1626_v7 = vstv %s1340_s30  ;;  %v1627_v39 = vstv %s1342_s4 }
 0x16d   : > { %v422_v11 = vpop.permute.xlu0 %421  ;;  %v424_v52 = vpop.permute.xlu1 %423  ;;  %v629_v30 = vadd.f32 %v628_v13, %v627_v59  ;;  %v641_v31 = vadd.f32 %v640_v0, %v639_v56  ;;  %v671_v5 = vadd.f32 %v670_v61, %v669_v3  ;;  %v1628_v44 = vstv %s1352_s5 }
 0x16e   : > { %v427_v45 = vsel %vm387_vm13, %v422_v11, %v424_v52  ;;  %v689_v21 = vadd.f32 %v688_v57, %v687_v26  ;;  %v1629_v50 = vmov %v1626_v7  ;;  %v1631_v13 = vmov %v1628_v44 }
 0x16f   : > { %v473_v14 = vmul.f32 %v472_v28, %v427_v45  ;;  %v491_v18 = vmul.f32 %v490_v33, %v427_v45  ;;  %v513_v19 = vmul.f32 %v512_v34, %v427_v45  ;;  %v538_v60 = vmul.f32 %v537_v29, %v427_v45 }
 0x170   : > { %v566_v27 = vmul.f32 %v565_v35, %v427_v45  ;;  %v571_v59 = vstv %s1534_s1 }
 0x171   : > { %v474_v12 = vadd.f32 %v473_v14, %v471_v62  ;;  %v596_v4 = vpop.permute.xlu0 %595  ;;  %v598_v16 = vpop.permute.xlu1 %597  ;;  %v492_v32 = vadd.f32 %v491_v18, %v489_v58  ;;  %v514_v2 = vadd.f32 %v513_v19, %v511_v17  ;;  %v1630_v62 = vmov %v1627_v39 }
 0x172   : > { %v599_v23 = vsel %vm387_vm13, %v596_v4, %v598_v16  ;;  %v567_v38 = vadd.f32 %v566_v27, %v564_v24  ;;  %v543_v58 = vstv %s1532_s0 }
 0x173   : > { %475 = vst [vmem:[%s1625_s18] sm:$0xff] %v474_v12  ;;  %v630_v22 = vmul.f32 %v599_v23, %v472_v28  ;;  %v655_v28 = vadd.f32 %v654_v46, %v653_v15  ;;  %v642_v25 = vmul.f32 %v599_v23, %v490_v33  ;;  %v656_v48 = vmul.f32 %v599_v23, %v512_v34 }
 0x174   : > { %v672_v8 = vmul.f32 %v599_v23, %v537_v29  ;;  %v690_v33 = vmul.f32 %v599_v23, %v565_v35  ;;  %v539_v34 = vadd.f32 %v538_v60, %v536_v53 }
 0x175   : > { %v631_v55 = vadd.f32 %v630_v22, %v629_v30  ;;  %v436_v42 = vpop.permute.xlu0 %435  ;;  %v438_v47 = vpop.permute.xlu1 %437  ;;  %v643_v29 = vadd.f32 %v642_v25, %v641_v31  ;;  %v657_v37 = vadd.f32 %v656_v48, %v655_v28 }
 0x176   : > { %v441_v6 = vsel %vm389_vm14, %v436_v42, %v438_v47  ;;  %v673_v56 = vadd.f32 %v672_v8, %v671_v5  ;;  %v691_v15 = vadd.f32 %v690_v33, %v689_v21 }
 0x177   : > { %632 = vst [vmem:[%s1625_s18 + $0x8] sm:$0xff] %v631_v55  ;;  %v494_v40 = vmul.f32 %v493_v36, %v441_v6  ;;  %v516_v20 = vmul.f32 %v1626_v7, %v441_v6  ;;  %v541_v54 = vmul.f32 %v1627_v39, %v441_v6  ;;  %v569_v10 = vmul.f32 %v1628_v44, %v441_v6 }
 0x179   : > { %v495_v9 = vadd.f32 %v494_v40, %v492_v32  ;;  %v517_v43 = vadd.f32 %v516_v20, %v514_v2  ;;  %v606_v49 = vpop.permute.xlu0 %605  ;;  %v608_v11 = vpop.permute.xlu1 %607  ;;  %v542_v12 = vadd.f32 %v541_v54, %v539_v34  ;;  %v570_v4 = vadd.f32 %v569_v10, %v567_v38 }
 0x17a   : > { %v609_v52 = vsel %vm389_vm14, %v606_v49, %v608_v11 }
 0x17b   : > { %869 = vst [vmem:[%s1625_s18 + $0x10] sm:$0xff] %v495_v9  ;;  %870 = vst [vmem:[%s1625_s18 + $0x20] sm:$0xff] %v517_v43  ;;  %v644_v35 = vmul.f32 %v609_v52, %v493_v36  ;;  %v658_v45 = vmul.f32 %v609_v52, %v1629_v50  ;;  %v674_v63 = vmul.f32 %v609_v52, %v1630_v62 }
 0x17c   : > { %v692_v14 = vmul.f32 %v609_v52, %v1631_v13 }
 0x17d   : > { %v645_v0 = vadd.f32 %v644_v35, %v643_v29  ;;  %v659_v46 = vadd.f32 %v658_v45, %v657_v37  ;;  %v452_v61 = vpop.permute.xlu0 %451  ;;  %v618_v16 = vpop.permute.xlu1 %617  ;;  %v675_v53 = vadd.f32 %v674_v63, %v673_v56 }
 0x17e   : > { %v455_v36 = vsel %vm391_vm15, %v1241_v41, %v452_v61  ;;  %v619_v17 = vsel %vm391_vm15, %v1304_v51, %v618_v16  ;;  %v693_v3 = vadd.f32 %v692_v14, %v691_v15 }
 0x17f   : > { %873 = vst [vmem:[%s1625_s18 + $0x18] sm:$0xff] %v645_v0  ;;  %874 = vst [vmem:[%s1625_s18 + $0x28] sm:$0xff] %v659_v46  ;;  %v544_v23 = vmul.f32 %v543_v58, %v455_v36  ;;  %v572_v30 = vmul.f32 %v571_v59, %v455_v36  ;;  %v676_v18 = vmul.f32 %v619_v17, %v543_v58 }
 0x180   : > { %v694_v19 = vmul.f32 %v619_v17, %v571_v59 }
 0x181   : > { %v545_v22 = vadd.f32 %v544_v23, %v542_v12  ;;  %v573_v24 = vadd.f32 %v572_v30, %v570_v4  ;;  %v677_v26 = vadd.f32 %v676_v18, %v675_v53 }
 0x182   : > { %v695_v57 = vadd.f32 %v694_v19, %v693_v3 }
 0x183   : > { %871 = vst [vmem:[%s1625_s18 + $0x30] sm:$0xff] %v545_v22  ;;  %872 = vst [vmem:[%s1625_s18 + $0x40] sm:$0xff] %v573_v24 }
 0x184   : > { %875 = vst [vmem:[%s1625_s18 + $0x38] sm:$0xff] %v677_v26  ;;  %876 = vst [vmem:[%s1625_s18 + $0x48] sm:$0xff] %v695_v57 }
 0x185 PF: > { %s1632_s2 = sld [smem:[#allocation7_spill]]  ;;  %s1633_s9 = sld [smem:[#allocation5_spill]] }
 0x186   : > { %s1634_s10 = sld [smem:[#allocation6_spill]]  ;;  %s1635_s11 = sld [smem:[#allocation8_spill]] }
 0x187   : > { %s1636_s12 = sld [smem:[#allocation9_spill]] }
 0x18b   : > { %s13_s13 = sadd.s32 1, %s1632_s2  }
 0x18c   : > { %p10_p6 = scmp.ge.s32.totalorder %s13_s13, 6  }
 0x18e   :  { %12 = sbr.rel (!%p10_p6) target bundleno = 7 (0x7), region = 79 }
 0x195   :  { %729 = vsyncpa [#allocation3], 1 }
 0x196   :  { %731 = vsyncpa [#allocation3 + $0x1], 1 }

</bundles_post_ra>
